<compile_context>
chip_gen: v7x
topology: tpu7x:2x2x1
jax: 0.10.0
libtpu: 0.0.40
codegen_flags: <defaults>
</compile_context>

<pallas_src>
import functools

import numpy as np

import jax
import jax.numpy as jnp
from jax import lax
from jax.experimental import pallas as pl
from jax.experimental.pallas import tpu as pltpu

_LANE = 128      # lane width: pad feature / output dims to a multiple of this
_SUBLANE = 8     # sublane width


def _round_up(x, m):
    return ((x + m - 1) // m) * m


# ----------------------------------------------------------------------------
# The single fused Pallas kernel:
#   camera im2col-GEMM -> per-channel fusion dots ; imu linear -> fusion ; head
# ----------------------------------------------------------------------------
def _fused_kernel(xs_ref, imu_ref,
                  wconv_ref, bconv_ref,
                  wimu_ref, bimu_ref,
                  wfcam_ref, wfimu_ref, bfus_ref,
                  whead_ref, bhead_ref,
                  out_ref, *, batch, out_ch):
    f32 = jnp.float32
    bf16 = jnp.bfloat16

    # ---- imu modality net + its fusion contribution (all samples at once) --
    imu_in = imu_ref[...].astype(bf16)                              # [B, F_imu]
    imu_act = jnp.dot(imu_in, wimu_ref[...], preferred_element_type=f32)
    imu_act = jnp.maximum(imu_act + bimu_ref[...], 0.0)             # [B, 128]
    imu_fus = jnp.dot(imu_act.astype(bf16), wfimu_ref[...],
                      preferred_element_type=f32)                   # [B, H_pad]

    # ---- camera modality net (im2col GEMM) + its fusion contribution -------
    # Per sample: conv[oc, p] = sum_t wconv[oc, t] * patches[t, p]  (MXU),
    # then fused_cam[h] = sum_{oc, p} relu(conv)[oc, p] * wf_cam[oc, p, h]
    # as 8 row-sliced MXU dots (no in-kernel reshape/transpose needed).
    wconv = wconv_ref[...]                                          # [OCp, Tp]
    h_pad = wfcam_ref.shape[-1]
    cam_rows = []
    for b in range(batch):                                          # unrolled (B tiny)
        patches = xs_ref[b].astype(bf16)                            # [Tp, Pp]
        conv = jnp.dot(wconv, patches, preferred_element_type=f32)  # [OCp, Pp]
        conv = jnp.maximum(conv + bconv_ref[...], 0.0).astype(bf16)
        acc = jnp.zeros((1, h_pad), f32)
        for oc in range(out_ch):                                    # unrolled (8)
            acc = acc + jnp.dot(conv[oc:oc + 1, :], wfcam_ref[oc],
                                preferred_element_type=f32)         # [1, H_pad]
        cam_rows.append(acc)
    cam_fus = jnp.concatenate(cam_rows, axis=0)                     # [B, H_pad]

    # ---- fusion model (bias + ReLU) and classification head ----------------
    fused = jnp.maximum(cam_fus + imu_fus + bfus_ref[...], 0.0)     # [B, H_pad]
    logits = jnp.dot(fused.astype(bf16), whead_ref[...],
                     preferred_element_type=f32)                    # [B, N_pad]
    out_ref[...] = logits + bhead_ref[...]


def _fused_forward_call(xs, imu2d, params, *, batch, out_ch):
    operands = (xs, imu2d,
                params["wconv"], params["bconv"],
                params["wimu"], params["bimu"],
                params["wf_cam"], params["wf_imu"], params["bfus"],
                params["whead"], params["bhead"])

    oc_pad, t_pad = params["wconv"].shape
    p_pad = params["bconv"].shape[1]
    h_pad = params["bfus"].shape[1]
    f_imu, imu_pad = params["wimu"].shape
    n_pad = params["bhead"].shape[1]

    flops = 2 * batch * (oc_pad * t_pad * p_pad        # conv im2col GEMM
                         + oc_pad * p_pad * h_pad      # camera fusion dots
                         + f_imu * imu_pad             # imu linear
                         + imu_pad * h_pad             # imu fusion
                         + h_pad * n_pad)              # classification head
    bytes_accessed = int(sum(o.size * o.dtype.itemsize for o in operands)
                         + batch * n_pad * 4)

    kernel = functools.partial(_fused_kernel, batch=batch, out_ch=out_ch)
    in_specs = [pl.BlockSpec(o.shape, lambda _n=o.ndim: (0,) * _n)
                for o in operands]
    return pl.pallas_call(
        kernel,
        out_shape=jax.ShapeDtypeStruct((batch, n_pad), jnp.float32),
        in_specs=in_specs,
        out_specs=pl.BlockSpec((batch, n_pad), lambda: (0, 0)),
        cost_estimate=pl.CostEstimate(flops=flops, transcendentals=0,
                                      bytes_accessed=bytes_accessed),
        compiler_params=pltpu.CompilerParams(
            vmem_limit_bytes=32 * 1024 * 1024),   # footprint ~1 MiB; plenty of headroom
    )(*operands)


def _forward_impl(params, camera, imu, *, num_classes, k, t_pad, p_pad, out_ch):
    """Host wrapper: im2col patch build (cheap, fused under jit) + one pallas_call."""
    B, C, H, W = camera.shape
    oh, ow = H - k + 1, W - k + 1
    # im2col: tap index t = c*k*k + i*k + j (matches wconv row-major reshape),
    # position index p = y*ow + x.  Stays f32; the bf16 cast happens in-kernel.
    cols = []
    for c in range(C):
        for i in range(k):
            for j in range(k):
                cols.append(camera[:, c, i:i + oh, j:j + ow].reshape(B, oh * ow))
    xs = jnp.stack(cols, axis=1)                                    # [B, C*k*k, oh*ow]
    xs = jnp.pad(xs, ((0, 0), (0, t_pad - C * k * k), (0, p_pad - oh * ow)))
    imu2d = imu.reshape(B, -1)                                      # view
    out = _fused_forward_call(xs, imu2d, params, batch=B, out_ch=out_ch)
    return out[:, :num_classes]


# ----------------------------------------------------------------------------
# Python mirror of the (abstract) base-class hierarchy
# ----------------------------------------------------------------------------
class ModelBaseClass:
    def num_flat_features(self, x):
        n = 1
        for s in x.shape[1:]:
            n *= s
        return int(n)

    def calculate_features_from_sample_batch(self, sample_batch):
        out = self.forward(sample_batch)
        self.num_flat_output_features = self.num_flat_features(out)
        self.shape_output_features = out.shape[1:]

    def get_num_flat_output_features(self):
        return self.num_flat_output_features

    def get_shape_output_features(self):
        return self.shape_output_features

    def forward(self, data_dict):
        raise RuntimeError("forward() of a base class shall not be called")


class ModalityNetBaseClass(ModelBaseClass):
    def __init__(self, sensor, modality_net_config_dict):
        self.sensor = sensor
        self.modality_net_config_dict = modality_net_config_dict

    def confirm_input_is_an_image(self, sample_batch):
        if len(sample_batch[self.sensor].shape) != 4:
            raise TypeError(f"Sensor {self.sensor}: expected image batch (B, C, H, W)!")

    def confirm_input_is_timeseries_data(self, sample_batch):
        if len(sample_batch[self.sensor].shape) != 3:
            raise TypeError(f"Sensor {self.sensor}: expected timeseries batch (B, C, T)!")


class FusionModelBaseClass(ModelBaseClass):
    def __init__(self, sensors, fusion_model_config_dict, modality_nets):
        self.sensors = sensors
        self.fusion_model_config_dict = fusion_model_config_dict
        self.modality_nets = modality_nets
        self.check_compatibility()

    def check_compatibility(self):
        if not isinstance(self.modality_nets, dict):
            raise TypeError("Modality nets are not provided in a dict!")
        for net in self.modality_nets.values():
            if type(net).__mro__[1] is not ModalityNetBaseClass:
                raise TypeError("At least one modality net is not a direct subclass "
                                "of ModalityNetBaseClass!")


class MultiModalBaseClass(ModelBaseClass):
    def __init__(self, num_classes, sensors, classification_head_config_dict, fusion_model):
        self.num_classes = num_classes
        self.sensors = sensors
        self.classification_head_config_dict = classification_head_config_dict
        self.fusion_model = fusion_model
        self.check_compatibility()

    def check_compatibility(self):
        if type(self.fusion_model).__mro__[1] is not FusionModelBaseClass:
            raise TypeError("The provided fusion model is not a direct subclass "
                            "of FusionModelBaseClass!")


# ----------------------------------------------------------------------------
# Concrete modality nets / fusion model / multi-modal model
# ----------------------------------------------------------------------------
class CameraModalityNet(ModalityNetBaseClass):
    """Conv2d(in_ch -> out_ch, kxk, valid) + ReLU, computed in the parent's
    fused Pallas kernel as an im2col GEMM against the real conv weight."""

    def __init__(self, key, sensor, in_ch, img_hw, out_ch=8, k=3):
        super().__init__(sensor, {"in_ch": in_ch, "out_ch": out_ch, "kernel": k})
        H, W = img_hw
        self.in_ch, self.out_ch, self.k, self.H, self.W = in_ch, out_ch, k, H, W
        self.oh, self.ow = H - k + 1, W - k + 1
        self.P = self.oh * self.ow
        k1, k2 = jax.random.split(key)
        fan_in = in_ch * k * k
        self.w = jax.random.normal(k1, (out_ch, in_ch, k, k), jnp.float32) * fan_in ** -0.5
        self.b = jax.random.normal(k2, (out_ch,), jnp.float32) * 0.01

        self.num_true_features = out_ch * self.P            # torch NCHW flatten order
        self.oc_pad = _round_up(out_ch, _SUBLANE)
        self.t_pad = _round_up(in_ch * k * k, _SUBLANE)     # im2col taps, 36 -> 40
        self.p_pad = _round_up(self.P, _LANE)               # spatial positions, 196 -> 256

        # conv weight as [oc, taps] (row-major reshape matches the host im2col order)
        wc = np.zeros((self.oc_pad, self.t_pad), np.float32)
        wc[:out_ch, :in_ch * k * k] = np.asarray(self.w, np.float32).reshape(out_ch, -1)
        self.wconv = jnp.asarray(wc, jnp.bfloat16)
        # bias pre-broadcast over positions (padded positions are killed by zero
        # rows in the fusion weight, so relu(bias) garbage there is harmless)
        bc = np.zeros((self.oc_pad, self.p_pad), np.float32)
        bc[:out_ch, :] = np.asarray(self.b, np.float32)[:, None]
        self.bconv = jnp.asarray(bc)


class IMUModalityNet(ModalityNetBaseClass):
    """Flatten timeseries -> Linear -> ReLU.  Fused into the parent kernel."""

    def __init__(self, key, sensor, in_feat, out_feat=32):
        super().__init__(sensor, {"in": in_feat, "out": out_feat})
        k1, k2 = jax.random.split(key)
        self.w = jax.random.normal(k1, (in_feat, out_feat), jnp.float32) * in_feat ** -0.5
        self.b = jax.random.normal(k2, (out_feat,), jnp.float32) * 0.01
        self.num_true_features = out_feat
        self.num_padded_features = _round_up(out_feat, _LANE)
        wpad = np.zeros((in_feat, self.num_padded_features), np.float32)
        wpad[:, :out_feat] = np.asarray(self.w, np.float32)
        bpad = np.zeros((1, self.num_padded_features), np.float32)
        bpad[0, :out_feat] = np.asarray(self.b, np.float32)
        self.wpad = jnp.asarray(wpad, jnp.bfloat16)
        self.bpad = jnp.asarray(bpad)


class ConcatFusionModel(FusionModelBaseClass):
    """concat(modality features) -> Linear -> ReLU.  The concat AND the
    conv-layout routing are folded into per-modality weight blocks at init
    (camera block stored per output channel as [oc, p, h]), so the fused
    kernel needs neither a concatenate nor a reshape/transpose."""

    def __init__(self, key, sensors, fusion_model_config_dict, modality_nets, out_feat=64):
        super().__init__(sensors, fusion_model_config_dict, modality_nets)
        cam, imu = modality_nets["camera"], modality_nets["imu"]
        in_feat = cam.num_true_features + imu.num_true_features
        k1, k2 = jax.random.split(key)
        self.w = jax.random.normal(k1, (in_feat, out_feat), jnp.float32) * in_feat ** -0.5
        self.b = jax.random.normal(k2, (out_feat,), jnp.float32) * 0.01
        self.out_feat = out_feat
        self.hidden_pad = _round_up(out_feat, _LANE)

        w_np = np.asarray(self.w, np.float32)
        # camera block: row f = oc*P + p of the full weight -> [oc, p, h]
        wc = np.zeros((cam.oc_pad, cam.p_pad, self.hidden_pad), np.float32)
        wc[:cam.out_ch, :cam.P, :out_feat] = (
            w_np[:cam.num_true_features].reshape(cam.out_ch, cam.P, out_feat))
        # imu block
        wi = np.zeros((imu.num_padded_features, self.hidden_pad), np.float32)
        wi[:imu.num_true_features, :out_feat] = w_np[cam.num_true_features:]
        bpad = np.zeros((1, self.hidden_pad), np.float32)
        bpad[0, :out_feat] = np.asarray(self.b, np.float32)
        self.wf_cam = jnp.asarray(wc, jnp.bfloat16)
        self.wf_imu = jnp.asarray(wi, jnp.bfloat16)
        self.bfus = jnp.asarray(bpad)


class MultiModalClassifier(MultiModalBaseClass):
    """Concrete MultiModal model: fusion model + classification head.
    The whole forward pass is one gridless fused Pallas kernel."""

    def __init__(self, key, num_classes, sensors, classification_head_config_dict,
                 fusion_model):
        super().__init__(num_classes, sensors, classification_head_config_dict, fusion_model)
        hid = fusion_model.out_feat
        k1, k2 = jax.random.split(key)
        self.w = jax.random.normal(k1, (hid, num_classes), jnp.float32) * hid ** -0.5
        self.b = jax.random.normal(k2, (num_classes,), jnp.float32) * 0.01

        n_pad = _round_up(num_classes, _LANE)
        wpad = np.zeros((fusion_model.hidden_pad, n_pad), np.float32)
        wpad[:hid, :num_classes] = np.asarray(self.w, np.float32)
        bpad = np.zeros((1, n_pad), np.float32)
        bpad[0, :num_classes] = np.asarray(self.b, np.float32)

        cam = fusion_model.modality_nets["camera"]
        imu = fusion_model.modality_nets["imu"]
        self.params = {
            "wconv": cam.wconv, "bconv": cam.bconv,
            "wimu": imu.wpad, "bimu": imu.bpad,
            "wf_cam": fusion_model.wf_cam, "wf_imu": fusion_model.wf_imu,
            "bfus": fusion_model.bfus,
            "whead": jnp.asarray(wpad, jnp.bfloat16), "bhead": jnp.asarray(bpad),
        }
        self._jit_forward = jax.jit(functools.partial(
            _forward_impl, num_classes=num_classes, k=cam.k,
            t_pad=cam.t_pad, p_pad=cam.p_pad, out_ch=cam.out_ch))

    def forward(self, data_dict):
        return self._jit_forward(self.params, data_dict["camera"], data_dict["imu"])


# ----------------------------------------------------------------------------
# Pure-JAX reference (f32) for a correctness sanity check
# ----------------------------------------------------------------------------
def reference_forward(model, data_dict):
    cam_net = model.fusion_model.modality_nets["camera"]
    imu_net = model.fusion_model.modality_nets["imu"]
    fus = model.fusion_model
    x = data_dict["camera"]
    B = x.shape[0]
    conv = lax.conv_general_dilated(x, cam_net.w, window_strides=(1, 1), padding="VALID",
                                    dimension_numbers=("NCHW", "OIHW", "NCHW"))
    conv = jnp.maximum(conv + cam_net.b.reshape(1, -1, 1, 1), 0.0)
    cam_feat = conv.reshape(B, -1)                             # NCHW flatten order
    imu_feat = jnp.maximum(data_dict["imu"].reshape(B, -1) @ imu_net.w + imu_net.b, 0.0)
    fused_in = jnp.concatenate([cam_feat, imu_feat], axis=1)
    fused = jnp.maximum(fused_in @ fus.w + fus.b, 0.0)
    return fused @ model.w + model.b


# ----------------------------------------------------------------------------
# Main
# ----------------------------------------------------------------------------
if __name__ == "__main__":
    key = jax.random.PRNGKey(0)
    k_cam, k_imu, k_fus, k_head, kx1, kx2 = jax.random.split(key, 6)

    B, C, H, W = 2, 4, 16, 16     # camera: NCHW
    Ct, T = 4, 8                  # imu timeseries: [B, C, T]
    NUM_CLASSES = 10

    data_dict = {
        "camera": jax.random.normal(kx1, (B, C, H, W), jnp.float32),
        "imu": jax.random.normal(kx2, (B, Ct, T), jnp.float32),
    }

    cam_net = CameraModalityNet(k_cam, "camera", in_ch=C, img_hw=(H, W), out_ch=8, k=3)
    imu_net = IMUModalityNet(k_imu, "imu", in_feat=Ct * T, out_feat=32)
    fusion = ConcatFusionModel(k_fus, ["camera", "imu"], {},
                               {"camera": cam_net, "imu": imu_net}, out_feat=64)
    model = MultiModalClassifier(k_head, NUM_CLASSES, ["camera", "imu"], {}, fusion)

    # exercise the base-class compatibility plumbing
    cam_net.confirm_input_is_an_image(data_dict)
    imu_net.confirm_input_is_timeseries_data(data_dict)

    logits = model.forward(data_dict)
    jax.block_until_ready(logits)
    assert logits.shape == (B, NUM_CLASSES)

    # correctness vs. pure-JAX f32 reference (kernel uses bf16 operands, f32 accum)
    ref = reference_forward(model, data_dict)
    err = float(jnp.max(jnp.abs(logits - ref)))
    assert err < 0.25, f"numerical mismatch vs reference: max abs err = {err}"

    # base-class feature plumbing
    model.calculate_features_from_sample_batch(data_dict)
    assert model.get_num_flat_output_features() == NUM_CLASSES
    assert tuple(model.get_shape_output_features()) == (NUM_CLASSES,)

    print("KERNEL_OK")
</pallas_src>

<mosaic_0001>
module attributes {stable_mosaic.version = 11 : i64} {
  func.func @_fused_kernel(%arg0: memref<2x40x256xf32, #tpu.memory_space<vmem>>, %arg1: memref<2x32xf32, #tpu.memory_space<vmem>>, %arg2: memref<8x40xbf16, #tpu.memory_space<vmem>>, %arg3: memref<8x256xf32, #tpu.memory_space<vmem>>, %arg4: memref<32x128xbf16, #tpu.memory_space<vmem>>, %arg5: memref<1x128xf32, #tpu.memory_space<vmem>>, %arg6: memref<8x256x128xbf16, #tpu.memory_space<vmem>>, %arg7: memref<128x128xbf16, #tpu.memory_space<vmem>>, %arg8: memref<1x128xf32, #tpu.memory_space<vmem>>, %arg9: memref<128x128xbf16, #tpu.memory_space<vmem>>, %arg10: memref<1x128xf32, #tpu.memory_space<vmem>>, %arg11: memref<2x128xf32, #tpu.memory_space<vmem>>) attributes {dimension_semantics = [], scalar_prefetch = 0 : i64, scratch_operands = 0 : i64, tpu.core_type = #tpu.core_type<tc>} {
    %c0 = arith.constant 0 : index
    %c0_0 = arith.constant 0 : index
    %0 = vector.load %arg1[%c0, %c0_0] : memref<2x32xf32, #tpu.memory_space<vmem>>, vector<2x32xf32>
    %1 = arith.truncf %0 : vector<2x32xf32> to vector<2x32xbf16>
    %c0_1 = arith.constant 0 : index
    %c0_2 = arith.constant 0 : index
    %2 = vector.load %arg4[%c0_1, %c0_2] : memref<32x128xbf16, #tpu.memory_space<vmem>>, vector<32x128xbf16>
    %cst = arith.constant dense<0.000000e+00> : vector<2x128xf32>
    %3 = tpu.matmul %1, %2, %cst {dimension_numbers = #tpu.dot_dimension_numbers<[1], [0], [0], [1], [0, 0, 1, 1], [], []>} : vector<2x32xbf16>, vector<32x128xbf16>, vector<2x128xf32> -> vector<2x128xf32>
    %c0_3 = arith.constant 0 : index
    %c0_4 = arith.constant 0 : index
    %4 = vector.load %arg5[%c0_3, %c0_4] : memref<1x128xf32, #tpu.memory_space<vmem>>, vector<1x128xf32>
    %5 = vector.broadcast %4 : vector<1x128xf32> to vector<2x128xf32>
    %6 = arith.addf %3, %5 : vector<2x128xf32>
    %cst_5 = arith.constant 0.000000e+00 : f32
    %7 = vector.broadcast %cst_5 : f32 to vector<2x128xf32>
    %8 = arith.maximumf %6, %7 : vector<2x128xf32>
    %9 = arith.truncf %8 : vector<2x128xf32> to vector<2x128xbf16>
    %c0_6 = arith.constant 0 : index
    %c0_7 = arith.constant 0 : index
    %10 = vector.load %arg7[%c0_6, %c0_7] : memref<128x128xbf16, #tpu.memory_space<vmem>>, vector<128x128xbf16>
    %cst_8 = arith.constant dense<0.000000e+00> : vector<2x128xf32>
    %11 = tpu.matmul %9, %10, %cst_8 {dimension_numbers = #tpu.dot_dimension_numbers<[1], [0], [0], [1], [0, 0, 1, 1], [], []>} : vector<2x128xbf16>, vector<128x128xbf16>, vector<2x128xf32> -> vector<2x128xf32>
    %c0_9 = arith.constant 0 : index
    %c0_10 = arith.constant 0 : index
    %12 = vector.load %arg2[%c0_9, %c0_10] : memref<8x40xbf16, #tpu.memory_space<vmem>>, vector<8x40xbf16>
    %c0_11 = arith.constant 0 : index
    %c0_12 = arith.constant 0 : index
    %c0_13 = arith.constant 0 : index
    %13 = vector.load %arg0[%c0_11, %c0_12, %c0_13] : memref<2x40x256xf32, #tpu.memory_space<vmem>>, vector<1x40x256xf32>
    %14 = vector.shape_cast %13 : vector<1x40x256xf32> to vector<40x256xf32>
    %15 = arith.truncf %14 : vector<40x256xf32> to vector<40x256xbf16>
    %cst_14 = arith.constant dense<0.000000e+00> : vector<8x256xf32>
    %16 = tpu.matmul %12, %15, %cst_14 {dimension_numbers = #tpu.dot_dimension_numbers<[1], [0], [0], [1], [0, 0, 1, 1], [], []>} : vector<8x40xbf16>, vector<40x256xbf16>, vector<8x256xf32> -> vector<8x256xf32>
    %c0_15 = arith.constant 0 : index
    %c0_16 = arith.constant 0 : index
    %17 = vector.load %arg3[%c0_15, %c0_16] : memref<8x256xf32, #tpu.memory_space<vmem>>, vector<8x256xf32>
    %18 = arith.addf %16, %17 : vector<8x256xf32>
    %cst_17 = arith.constant 0.000000e+00 : f32
    %19 = vector.broadcast %cst_17 : f32 to vector<8x256xf32>
    %20 = arith.maximumf %18, %19 : vector<8x256xf32>
    %21 = arith.truncf %20 : vector<8x256xf32> to vector<8x256xbf16>
    %cst_18 = arith.constant 0.000000e+00 : f32
    %22 = vector.broadcast %cst_18 : f32 to vector<1x128xf32>
    %23 = vector.extract_strided_slice %21 {offsets = [0, 0], sizes = [1, 256], strides = [1, 1]} : vector<8x256xbf16> to vector<1x256xbf16>
    %c0_19 = arith.constant 0 : index
    %c0_20 = arith.constant 0 : index
    %c0_21 = arith.constant 0 : index
    %24 = vector.load %arg6[%c0_19, %c0_20, %c0_21] : memref<8x256x128xbf16, #tpu.memory_space<vmem>>, vector<1x256x128xbf16>
    %25 = vector.shape_cast %24 : vector<1x256x128xbf16> to vector<256x128xbf16>
    %cst_22 = arith.constant dense<0.000000e+00> : vector<1x128xf32>
    %26 = tpu.matmul %23, %25, %cst_22 {dimension_numbers = #tpu.dot_dimension_numbers<[1], [0], [0], [1], [0, 0, 1, 1], [], []>} : vector<1x256xbf16>, vector<256x128xbf16>, vector<1x128xf32> -> vector<1x128xf32>
    %27 = arith.addf %22, %26 : vector<1x128xf32>
    %28 = vector.extract_strided_slice %21 {offsets = [1, 0], sizes = [1, 256], strides = [1, 1]} : vector<8x256xbf16> to vector<1x256xbf16>
    %c1 = arith.constant 1 : index
    %c0_23 = arith.constant 0 : index
    %c0_24 = arith.constant 0 : index
    %29 = vector.load %arg6[%c1, %c0_23, %c0_24] : memref<8x256x128xbf16, #tpu.memory_space<vmem>>, vector<1x256x128xbf16>
    %30 = vector.shape_cast %29 : vector<1x256x128xbf16> to vector<256x128xbf16>
    %cst_25 = arith.constant dense<0.000000e+00> : vector<1x128xf32>
    %31 = tpu.matmul %28, %30, %cst_25 {dimension_numbers = #tpu.dot_dimension_numbers<[1], [0], [0], [1], [0, 0, 1, 1], [], []>} : vector<1x256xbf16>, vector<256x128xbf16>, vector<1x128xf32> -> vector<1x128xf32>
    %32 = arith.addf %27, %31 : vector<1x128xf32>
    %33 = vector.extract_strided_slice %21 {offsets = [2, 0], sizes = [1, 256], strides = [1, 1]} : vector<8x256xbf16> to vector<1x256xbf16>
    %c2 = arith.constant 2 : index
    %c0_26 = arith.constant 0 : index
    %c0_27 = arith.constant 0 : index
    %34 = vector.load %arg6[%c2, %c0_26, %c0_27] : memref<8x256x128xbf16, #tpu.memory_space<vmem>>, vector<1x256x128xbf16>
    %35 = vector.shape_cast %34 : vector<1x256x128xbf16> to vector<256x128xbf16>
    %cst_28 = arith.constant dense<0.000000e+00> : vector<1x128xf32>
    %36 = tpu.matmul %33, %35, %cst_28 {dimension_numbers = #tpu.dot_dimension_numbers<[1], [0], [0], [1], [0, 0, 1, 1], [], []>} : vector<1x256xbf16>, vector<256x128xbf16>, vector<1x128xf32> -> vector<1x128xf32>
    %37 = arith.addf %32, %36 : vector<1x128xf32>
    %38 = vector.extract_strided_slice %21 {offsets = [3, 0], sizes = [1, 256], strides = [1, 1]} : vector<8x256xbf16> to vector<1x256xbf16>
    %c3 = arith.constant 3 : index
    %c0_29 = arith.constant 0 : index
    %c0_30 = arith.constant 0 : index
    %39 = vector.load %arg6[%c3, %c0_29, %c0_30] : memref<8x256x128xbf16, #tpu.memory_space<vmem>>, vector<1x256x128xbf16>
    %40 = vector.shape_cast %39 : vector<1x256x128xbf16> to vector<256x128xbf16>
    %cst_31 = arith.constant dense<0.000000e+00> : vector<1x128xf32>
    %41 = tpu.matmul %38, %40, %cst_31 {dimension_numbers = #tpu.dot_dimension_numbers<[1], [0], [0], [1], [0, 0, 1, 1], [], []>} : vector<1x256xbf16>, vector<256x128xbf16>, vector<1x128xf32> -> vector<1x128xf32>
    %42 = arith.addf %37, %41 : vector<1x128xf32>
    %43 = vector.extract_strided_slice %21 {offsets = [4, 0], sizes = [1, 256], strides = [1, 1]} : vector<8x256xbf16> to vector<1x256xbf16>
    %c4 = arith.constant 4 : index
    %c0_32 = arith.constant 0 : index
    %c0_33 = arith.constant 0 : index
    %44 = vector.load %arg6[%c4, %c0_32, %c0_33] : memref<8x256x128xbf16, #tpu.memory_space<vmem>>, vector<1x256x128xbf16>
    %45 = vector.shape_cast %44 : vector<1x256x128xbf16> to vector<256x128xbf16>
    %cst_34 = arith.constant dense<0.000000e+00> : vector<1x128xf32>
    %46 = tpu.matmul %43, %45, %cst_34 {dimension_numbers = #tpu.dot_dimension_numbers<[1], [0], [0], [1], [0, 0, 1, 1], [], []>} : vector<1x256xbf16>, vector<256x128xbf16>, vector<1x128xf32> -> vector<1x128xf32>
    %47 = arith.addf %42, %46 : vector<1x128xf32>
    %48 = vector.extract_strided_slice %21 {offsets = [5, 0], sizes = [1, 256], strides = [1, 1]} : vector<8x256xbf16> to vector<1x256xbf16>
    %c5 = arith.constant 5 : index
    %c0_35 = arith.constant 0 : index
    %c0_36 = arith.constant 0 : index
    %49 = vector.load %arg6[%c5, %c0_35, %c0_36] : memref<8x256x128xbf16, #tpu.memory_space<vmem>>, vector<1x256x128xbf16>
    %50 = vector.shape_cast %49 : vector<1x256x128xbf16> to vector<256x128xbf16>
    %cst_37 = arith.constant dense<0.000000e+00> : vector<1x128xf32>
    %51 = tpu.matmul %48, %50, %cst_37 {dimension_numbers = #tpu.dot_dimension_numbers<[1], [0], [0], [1], [0, 0, 1, 1], [], []>} : vector<1x256xbf16>, vector<256x128xbf16>, vector<1x128xf32> -> vector<1x128xf32>
    %52 = arith.addf %47, %51 : vector<1x128xf32>
    %53 = vector.extract_strided_slice %21 {offsets = [6, 0], sizes = [1, 256], strides = [1, 1]} : vector<8x256xbf16> to vector<1x256xbf16>
    %c6 = arith.constant 6 : index
    %c0_38 = arith.constant 0 : index
    %c0_39 = arith.constant 0 : index
    %54 = vector.load %arg6[%c6, %c0_38, %c0_39] : memref<8x256x128xbf16, #tpu.memory_space<vmem>>, vector<1x256x128xbf16>
    %55 = vector.shape_cast %54 : vector<1x256x128xbf16> to vector<256x128xbf16>
    %cst_40 = arith.constant dense<0.000000e+00> : vector<1x128xf32>
    %56 = tpu.matmul %53, %55, %cst_40 {dimension_numbers = #tpu.dot_dimension_numbers<[1], [0], [0], [1], [0, 0, 1, 1], [], []>} : vector<1x256xbf16>, vector<256x128xbf16>, vector<1x128xf32> -> vector<1x128xf32>
    %57 = arith.addf %52, %56 : vector<1x128xf32>
    %58 = vector.extract_strided_slice %21 {offsets = [7, 0], sizes = [1, 256], strides = [1, 1]} : vector<8x256xbf16> to vector<1x256xbf16>
    %c7 = arith.constant 7 : index
    %c0_41 = arith.constant 0 : index
    %c0_42 = arith.constant 0 : index
    %59 = vector.load %arg6[%c7, %c0_41, %c0_42] : memref<8x256x128xbf16, #tpu.memory_space<vmem>>, vector<1x256x128xbf16>
    %60 = vector.shape_cast %59 : vector<1x256x128xbf16> to vector<256x128xbf16>
    %cst_43 = arith.constant dense<0.000000e+00> : vector<1x128xf32>
    %61 = tpu.matmul %58, %60, %cst_43 {dimension_numbers = #tpu.dot_dimension_numbers<[1], [0], [0], [1], [0, 0, 1, 1], [], []>} : vector<1x256xbf16>, vector<256x128xbf16>, vector<1x128xf32> -> vector<1x128xf32>
    %62 = arith.addf %57, %61 : vector<1x128xf32>
    %c1_44 = arith.constant 1 : index
    %c0_45 = arith.constant 0 : index
    %c0_46 = arith.constant 0 : index
    %63 = vector.load %arg0[%c1_44, %c0_45, %c0_46] : memref<2x40x256xf32, #tpu.memory_space<vmem>>, vector<1x40x256xf32>
    %64 = vector.shape_cast %63 : vector<1x40x256xf32> to vector<40x256xf32>
    %65 = arith.truncf %64 : vector<40x256xf32> to vector<40x256xbf16>
    %cst_47 = arith.constant dense<0.000000e+00> : vector<8x256xf32>
    %66 = tpu.matmul %12, %65, %cst_47 {dimension_numbers = #tpu.dot_dimension_numbers<[1], [0], [0], [1], [0, 0, 1, 1], [], []>} : vector<8x40xbf16>, vector<40x256xbf16>, vector<8x256xf32> -> vector<8x256xf32>
    %c0_48 = arith.constant 0 : index
    %c0_49 = arith.constant 0 : index
    %67 = vector.load %arg3[%c0_48, %c0_49] : memref<8x256xf32, #tpu.memory_space<vmem>>, vector<8x256xf32>
    %68 = arith.addf %66, %67 : vector<8x256xf32>
    %cst_50 = arith.constant 0.000000e+00 : f32
    %69 = vector.broadcast %cst_50 : f32 to vector<8x256xf32>
    %70 = arith.maximumf %68, %69 : vector<8x256xf32>
    %71 = arith.truncf %70 : vector<8x256xf32> to vector<8x256xbf16>
    %cst_51 = arith.constant 0.000000e+00 : f32
    %72 = vector.broadcast %cst_51 : f32 to vector<1x128xf32>
    %73 = vector.extract_strided_slice %71 {offsets = [0, 0], sizes = [1, 256], strides = [1, 1]} : vector<8x256xbf16> to vector<1x256xbf16>
    %c0_52 = arith.constant 0 : index
    %c0_53 = arith.constant 0 : index
    %c0_54 = arith.constant 0 : index
    %74 = vector.load %arg6[%c0_52, %c0_53, %c0_54] : memref<8x256x128xbf16, #tpu.memory_space<vmem>>, vector<1x256x128xbf16>
    %75 = vector.shape_cast %74 : vector<1x256x128xbf16> to vector<256x128xbf16>
    %cst_55 = arith.constant dense<0.000000e+00> : vector<1x128xf32>
    %76 = tpu.matmul %73, %75, %cst_55 {dimension_numbers = #tpu.dot_dimension_numbers<[1], [0], [0], [1], [0, 0, 1, 1], [], []>} : vector<1x256xbf16>, vector<256x128xbf16>, vector<1x128xf32> -> vector<1x128xf32>
    %77 = arith.addf %72, %76 : vector<1x128xf32>
    %78 = vector.extract_strided_slice %71 {offsets = [1, 0], sizes = [1, 256], strides = [1, 1]} : vector<8x256xbf16> to vector<1x256xbf16>
    %c1_56 = arith.constant 1 : index
    %c0_57 = arith.constant 0 : index
    %c0_58 = arith.constant 0 : index
    %79 = vector.load %arg6[%c1_56, %c0_57, %c0_58] : memref<8x256x128xbf16, #tpu.memory_space<vmem>>, vector<1x256x128xbf16>
    %80 = vector.shape_cast %79 : vector<1x256x128xbf16> to vector<256x128xbf16>
    %cst_59 = arith.constant dense<0.000000e+00> : vector<1x128xf32>
    %81 = tpu.matmul %78, %80, %cst_59 {dimension_numbers = #tpu.dot_dimension_numbers<[1], [0], [0], [1], [0, 0, 1, 1], [], []>} : vector<1x256xbf16>, vector<256x128xbf16>, vector<1x128xf32> -> vector<1x128xf32>
    %82 = arith.addf %77, %81 : vector<1x128xf32>
    %83 = vector.extract_strided_slice %71 {offsets = [2, 0], sizes = [1, 256], strides = [1, 1]} : vector<8x256xbf16> to vector<1x256xbf16>
    %c2_60 = arith.constant 2 : index
    %c0_61 = arith.constant 0 : index
    %c0_62 = arith.constant 0 : index
    %84 = vector.load %arg6[%c2_60, %c0_61, %c0_62] : memref<8x256x128xbf16, #tpu.memory_space<vmem>>, vector<1x256x128xbf16>
    %85 = vector.shape_cast %84 : vector<1x256x128xbf16> to vector<256x128xbf16>
    %cst_63 = arith.constant dense<0.000000e+00> : vector<1x128xf32>
    %86 = tpu.matmul %83, %85, %cst_63 {dimension_numbers = #tpu.dot_dimension_numbers<[1], [0], [0], [1], [0, 0, 1, 1], [], []>} : vector<1x256xbf16>, vector<256x128xbf16>, vector<1x128xf32> -> vector<1x128xf32>
    %87 = arith.addf %82, %86 : vector<1x128xf32>
    %88 = vector.extract_strided_slice %71 {offsets = [3, 0], sizes = [1, 256], strides = [1, 1]} : vector<8x256xbf16> to vector<1x256xbf16>
    %c3_64 = arith.constant 3 : index
    %c0_65 = arith.constant 0 : index
    %c0_66 = arith.constant 0 : index
    %89 = vector.load %arg6[%c3_64, %c0_65, %c0_66] : memref<8x256x128xbf16, #tpu.memory_space<vmem>>, vector<1x256x128xbf16>
    %90 = vector.shape_cast %89 : vector<1x256x128xbf16> to vector<256x128xbf16>
    %cst_67 = arith.constant dense<0.000000e+00> : vector<1x128xf32>
    %91 = tpu.matmul %88, %90, %cst_67 {dimension_numbers = #tpu.dot_dimension_numbers<[1], [0], [0], [1], [0, 0, 1, 1], [], []>} : vector<1x256xbf16>, vector<256x128xbf16>, vector<1x128xf32> -> vector<1x128xf32>
    %92 = arith.addf %87, %91 : vector<1x128xf32>
    %93 = vector.extract_strided_slice %71 {offsets = [4, 0], sizes = [1, 256], strides = [1, 1]} : vector<8x256xbf16> to vector<1x256xbf16>
    %c4_68 = arith.constant 4 : index
    %c0_69 = arith.constant 0 : index
    %c0_70 = arith.constant 0 : index
    %94 = vector.load %arg6[%c4_68, %c0_69, %c0_70] : memref<8x256x128xbf16, #tpu.memory_space<vmem>>, vector<1x256x128xbf16>
    %95 = vector.shape_cast %94 : vector<1x256x128xbf16> to vector<256x128xbf16>
    %cst_71 = arith.constant dense<0.000000e+00> : vector<1x128xf32>
    %96 = tpu.matmul %93, %95, %cst_71 {dimension_numbers = #tpu.dot_dimension_numbers<[1], [0], [0], [1], [0, 0, 1, 1], [], []>} : vector<1x256xbf16>, vector<256x128xbf16>, vector<1x128xf32> -> vector<1x128xf32>
    %97 = arith.addf %92, %96 : vector<1x128xf32>
    %98 = vector.extract_strided_slice %71 {offsets = [5, 0], sizes = [1, 256], strides = [1, 1]} : vector<8x256xbf16> to vector<1x256xbf16>
    %c5_72 = arith.constant 5 : index
    %c0_73 = arith.constant 0 : index
    %c0_74 = arith.constant 0 : index
    %99 = vector.load %arg6[%c5_72, %c0_73, %c0_74] : memref<8x256x128xbf16, #tpu.memory_space<vmem>>, vector<1x256x128xbf16>
    %100 = vector.shape_cast %99 : vector<1x256x128xbf16> to vector<256x128xbf16>
    %cst_75 = arith.constant dense<0.000000e+00> : vector<1x128xf32>
    %101 = tpu.matmul %98, %100, %cst_75 {dimension_numbers = #tpu.dot_dimension_numbers<[1], [0], [0], [1], [0, 0, 1, 1], [], []>} : vector<1x256xbf16>, vector<256x128xbf16>, vector<1x128xf32> -> vector<1x128xf32>
    %102 = arith.addf %97, %101 : vector<1x128xf32>
    %103 = vector.extract_strided_slice %71 {offsets = [6, 0], sizes = [1, 256], strides = [1, 1]} : vector<8x256xbf16> to vector<1x256xbf16>
    %c6_76 = arith.constant 6 : index
    %c0_77 = arith.constant 0 : index
    %c0_78 = arith.constant 0 : index
    %104 = vector.load %arg6[%c6_76, %c0_77, %c0_78] : memref<8x256x128xbf16, #tpu.memory_space<vmem>>, vector<1x256x128xbf16>
    %105 = vector.shape_cast %104 : vector<1x256x128xbf16> to vector<256x128xbf16>
    %cst_79 = arith.constant dense<0.000000e+00> : vector<1x128xf32>
    %106 = tpu.matmul %103, %105, %cst_79 {dimension_numbers = #tpu.dot_dimension_numbers<[1], [0], [0], [1], [0, 0, 1, 1], [], []>} : vector<1x256xbf16>, vector<256x128xbf16>, vector<1x128xf32> -> vector<1x128xf32>
    %107 = arith.addf %102, %106 : vector<1x128xf32>
    %108 = vector.extract_strided_slice %71 {offsets = [7, 0], sizes = [1, 256], strides = [1, 1]} : vector<8x256xbf16> to vector<1x256xbf16>
    %c7_80 = arith.constant 7 : index
    %c0_81 = arith.constant 0 : index
    %c0_82 = arith.constant 0 : index
    %109 = vector.load %arg6[%c7_80, %c0_81, %c0_82] : memref<8x256x128xbf16, #tpu.memory_space<vmem>>, vector<1x256x128xbf16>
    %110 = vector.shape_cast %109 : vector<1x256x128xbf16> to vector<256x128xbf16>
    %cst_83 = arith.constant dense<0.000000e+00> : vector<1x128xf32>
    %111 = tpu.matmul %108, %110, %cst_83 {dimension_numbers = #tpu.dot_dimension_numbers<[1], [0], [0], [1], [0, 0, 1, 1], [], []>} : vector<1x256xbf16>, vector<256x128xbf16>, vector<1x128xf32> -> vector<1x128xf32>
    %112 = arith.addf %107, %111 : vector<1x128xf32>
    %113 = tpu.concatenate %62, %112 in 0 : vector<1x128xf32>, vector<1x128xf32> -> vector<2x128xf32>
    %114 = arith.addf %113, %11 : vector<2x128xf32>
    %c0_84 = arith.constant 0 : index
    %c0_85 = arith.constant 0 : index
    %115 = vector.load %arg8[%c0_84, %c0_85] : memref<1x128xf32, #tpu.memory_space<vmem>>, vector<1x128xf32>
    %116 = vector.broadcast %115 : vector<1x128xf32> to vector<2x128xf32>
    %117 = arith.addf %114, %116 : vector<2x128xf32>
    %cst_86 = arith.constant 0.000000e+00 : f32
    %118 = vector.broadcast %cst_86 : f32 to vector<2x128xf32>
    %119 = arith.maximumf %117, %118 : vector<2x128xf32>
    %120 = arith.truncf %119 : vector<2x128xf32> to vector<2x128xbf16>
    %c0_87 = arith.constant 0 : index
    %c0_88 = arith.constant 0 : index
    %121 = vector.load %arg9[%c0_87, %c0_88] : memref<128x128xbf16, #tpu.memory_space<vmem>>, vector<128x128xbf16>
    %cst_89 = arith.constant dense<0.000000e+00> : vector<2x128xf32>
    %122 = tpu.matmul %120, %121, %cst_89 {dimension_numbers = #tpu.dot_dimension_numbers<[1], [0], [0], [1], [0, 0, 1, 1], [], []>} : vector<2x128xbf16>, vector<128x128xbf16>, vector<2x128xf32> -> vector<2x128xf32>
    %c0_90 = arith.constant 0 : index
    %c0_91 = arith.constant 0 : index
    %123 = vector.load %arg10[%c0_90, %c0_91] : memref<1x128xf32, #tpu.memory_space<vmem>>, vector<1x128xf32>
    %124 = vector.broadcast %123 : vector<1x128xf32> to vector<2x128xf32>
    %125 = arith.addf %122, %124 : vector<2x128xf32>
    %c0_92 = arith.constant 0 : index
    %c0_93 = arith.constant 0 : index
    %126 = vector.load %arg11[%c0_92, %c0_93] : memref<2x128xf32, #tpu.memory_space<vmem>>, vector<2x128xf32>
    tpu.vector_store %arg11[%c0_92, %c0_93], %125 {strides = array<i32>} : memref<2x128xf32, #tpu.memory_space<vmem>>, vector<2x128xf32>,
    return
  }
}

</mosaic_0001>

<bundles_post_ra>
// kernel: squeeze.53
= control target key start
LH: loop header
LB: loop body
LE: loop exit
PB: predicated region body
PF: predicated region fallthrough
CT: control target
= control target key end

     0   :  { %s7_s6 = smov 3  ;;  %s10_s7 = smov 3  ;;  %vm12_vm0 = vcmask 15360   ;;  %vm4_vm1 = vcmask 113664   ;;  %vm16_vm2 = vcmask 97280   ;;  %vm19_vm3 = vcmask 1048560   ;;  %s244_s0 = inlined_call_operand.vmem [shape: f32[2,1,14,14], index: 0, kind: input, shape index: {}]   ;;  %s245_s1 = inlined_call_operand.vmem [shape: f32[2,1,196], index: 1, kind: output, shape index: {}]  }
   0x1   :  { %v134_v0 = vld [vmem:[%s244_s0 + $0x9] ss:$16 sm:%s7_s6]   ;;  %s29_s12 = smov 3  ;;  %s22_s15 = smov 3  ;;  %vm26_vm4 = vcmask 1032064   ;;  %vm33_vm5 = vcmask 917264  }
   0x2   :  { %v135_v1 = vld [vmem:[%s244_s0 + $0x9] ss:$16 sm:%s10_s7]   ;;  %v137_v3 = vld [vmem:[%s244_s0 + $0x7] ss:$16 sm:%s29_s12]   ;;  %s164_s16 = smov 126   ;;  %s165_s17 = smov 98  }
   0x3   :  { %v13_v2 = vsel %vm12_vm0, %v135_v1, %v134_v0  ;;  %31 = vrot.lane.b32.xlu1 %v137_v3, %s165_s17  ;;  %s36_s18 = smov 3  ;;  %v136_v4 = vld [vmem:[%s244_s0 + $0x8] ss:$16 sm:%s22_s15]   ;;  %s43_s23 = smov 3  ;;  %vm40_vm6 = vcmask 802464   ;;  %vm47_vm7 = vcmask 687664  }
   0x4   :  { %14 = vrot.lane.b32.xlu0 %v13_v2, %s164_s16  ;;  %v138_v5 = vld [vmem:[%s244_s0 + $0x6] ss:$16 sm:%s36_s18]   ;;  %s50_s24 = smov 3  ;;  %s166_s25 = smov 112   ;;  %vm54_vm8 = vcmask 572864   ;;  %vm61_vm9 = vcmask 556464  }
   0x5   :  { %s167_s26 = smov 84   ;;  %v139_v6 = vld [vmem:[%s244_s0 + $0x5] ss:$16 sm:%s43_s23]   ;;  %v140_v7 = vld [vmem:[%s244_s0 + $0x4] ss:$16 sm:%s50_s24]   ;;  %s57_s2 = smov 3 }
   0x6   :  { %s65_s3 = smov 3  ;;  %s168_s4 = smov 70   ;;  %v141_v8 = vld [vmem:[%s244_s0 + $0xd] ss:$16 sm:%s57_s2]   ;;  %vm69_vm10 = vcmask 458064   ;;  %vm76_vm11 = vcmask 441664  }
   0x7   :  { %38 = vrot.lane.b32.xlu1 %v138_v5, %s167_s26  ;;  %s169_s5 = smov 56   ;;  %v142_v9 = vld [vmem:[%s244_s0 + $0x3] ss:$16 sm:%s65_s3]   ;;  %s72_s10 = smov 3  ;;  %vm84_vm12 = vcmask 343264   ;;  %vm91_vm13 = vcmask 326864  }
   0x8   :  { %24 = vrot.lane.b32.xlu0 %v136_v4, %s166_s25  ;;  %s80_s11 = smov 3  ;;  %s2_s12 = smov 3  ;;  %v143_v11 = vld [vmem:[%s244_s0 + $0xc] ss:$16 sm:%s72_s10]   ;;  %vm99_vm14 = vcmask 228464   ;;  %vm106_vm15 = vcmask 212064  }
   0x9   :  { %v3_v10 = vld [vmem:[%s244_s0] ss:$16 sm:%s2_s12]   ;;  %s170_s15 = smov 54   ;;  %s171_s16 = smov 42   ;;  %v144_v12 = vld [vmem:[%s244_s0 + $0x2] ss:$16 sm:%s80_s11]  }
   0xa   :  { %5 = vst.msk [vmem:[#allocation0] ss:$16 sm:$0x3] %vm4_vm1, %v3_v10   ;;  %s87_s21 = smov 3  ;;  %s95_s22 = smov 3 }
   0xb   :  { %52 = vrot.lane.b32.xlu1 %v140_v7, %s169_s5  ;;  %s172_s23 = smov 40   ;;  %s173_s24 = smov 28   ;;  %v145_v13 = vld [vmem:[%s244_s0 + $0xb] ss:$16 sm:%s87_s21]  }
   0xc   :  { %45 = vrot.lane.b32.xlu0 %v139_v6, %s168_s4  ;;  %v146_v14 = vld [vmem:[%s244_s0 + $0x1] ss:$16 sm:%s95_s22]   ;;  %s102_s29 = smov 3  ;;  %s174_s30 = smov 26  }
   0xd   :  { %s175_s2 = smov 14   ;;  %v147_v15 = vld [vmem:[%s244_s0 + $0xa] ss:$16 sm:%s102_s29]   ;;  %s176_s0 = smov 12  }
   0xf   :  { %67 = vrot.lane.b32.xlu1 %v142_v9, %s171_s16 }
  0x10   :  { %59 = vrot.lane.b32.xlu0 %v141_v8, %s170_s15 }
  0x13   :  { %82 = vrot.lane.b32.xlu1 %v144_v12, %s173_s24 }
  0x14   :  { %74 = vrot.lane.b32.xlu0 %v143_v11, %s172_s23 }
  0x17   :  { %97 = vrot.lane.b32.xlu1 %v146_v14, %s175_s2 }
  0x18   :  { %89 = vrot.lane.b32.xlu0 %v145_v13, %s174_s30 }
  0x1c   :  { %104 = vrot.lane.b32.xlu0 %v147_v15, %s176_s0 }
  0x75   :  { %v32_v17 = vpop.permute.xlu1 %31  }
  0x76   :  { %v15_v16 = vpop.permute.xlu0 %14  }
  0x77   :  { %18 = vst.msk [vmem:[#allocation0 + $0x8] ss:$16 sm:$0x3] %vm16_vm2, %v15_v16  }
  0x78   :  { %20 = vst.msk [vmem:[#allocation0] ss:$16 sm:$0x3] %vm19_vm3, %v15_v16  }
  0x79   :  { %v39_v19 = vpop.permute.xlu1 %38  }
  0x7a   :  { %v25_v18 = vpop.permute.xlu0 %24  }
  0x7b   :  { %27 = vst.msk [vmem:[#allocation0] ss:$16 sm:$0x3] %vm26_vm4, %v25_v18  }
  0x7c   :  { %34 = vst.msk [vmem:[#allocation0] ss:$16 sm:$0x3] %vm33_vm5, %v32_v17  }
  0x7d   :  { %41 = vst.msk [vmem:[#allocation0] ss:$16 sm:$0x3] %vm40_vm6, %v39_v19   ;;  %v53_v21 = vpop.permute.xlu1 %52  }
  0x7e   :  { %v46_v20 = vpop.permute.xlu0 %45  }
  0x7f   :  { %48 = vst.msk [vmem:[#allocation0] ss:$16 sm:$0x3] %vm47_vm7, %v46_v20  }
  0x80   :  { %55 = vst.msk [vmem:[#allocation0] ss:$16 sm:$0x3] %vm54_vm8, %v53_v21  }
  0x81   :  { %v68_v23 = vpop.permute.xlu1 %67  }
  0x82   :  { %v60_v22 = vpop.permute.xlu0 %59   ;;  %70 = vst.msk [vmem:[#allocation0] ss:$16 sm:$0x3] %vm69_vm10, %v68_v23  }
  0x83   :  { %63 = vst.msk [vmem:[#allocation0 + $0x8] ss:$16 sm:$0x3] %vm61_vm9, %v60_v22  }
  0x85   :  { %v83_v25 = vpop.permute.xlu1 %82  }
  0x86   :  { %v75_v24 = vpop.permute.xlu0 %74   ;;  %85 = vst.msk [vmem:[#allocation0] ss:$16 sm:$0x3] %vm84_vm12, %v83_v25  }
  0x87   :  { %78 = vst.msk [vmem:[#allocation0 + $0x8] ss:$16 sm:$0x3] %vm76_vm11, %v75_v24  }
  0x89   :  { %v98_v27 = vpop.permute.xlu1 %97  }
  0x8a   :  { %v90_v26 = vpop.permute.xlu0 %89   ;;  %100 = vst.msk [vmem:[#allocation0] ss:$16 sm:$0x3] %vm99_vm14, %v98_v27  }
  0x8b   :  { %93 = vst.msk [vmem:[#allocation0 + $0x8] ss:$16 sm:$0x3] %vm91_vm13, %v90_v26  }
  0x8e   :  { %v105_v28 = vpop.permute.xlu0 %104  }
  0x8f   :  { %108 = vst.msk [vmem:[#allocation0 + $0x8] ss:$16 sm:$0x3] %vm106_vm15, %v105_v28  }
  0x91   :  { %v112_v29 = vld [vmem:[#allocation0] sm:$0x1]  ;;  %v121_v30 = vld [vmem:[#allocation0 + $0x10] sm:$0x1] }
  0x92   :  { %114 = vst [vmem:[%s245_s1] sm:$0x1] %v112_v29  ;;  %149 = vst [vmem:[%s245_s1 + $0x2] sm:$0x1] %v121_v30 }
  0x96   :  { %v116_v31 = vld [vmem:[#allocation0 + $0x8] sm:$0x1]  ;;  %v127_v32 = vld [vmem:[#allocation0 + $0x18] sm:$0x1] }
  0x97   :  { %148 = vst [vmem:[%s245_s1 + $0x1] sm:$0x1] %v116_v31  ;;  %150 = vst [vmem:[%s245_s1 + $0x3] sm:$0x1] %v127_v32 }

// kernel: _forward_impl.1
= control target key start
LH: loop header
LB: loop body
LE: loop exit
PB: predicated region body
PF: predicated region fallthrough
CT: control target
= control target key end

     0   :  { %v4455_v1 = vmov 0.0   ;;  %vm3235_vm0 = vmmov 0   ;;  %vm65_vm1 = vcmask 261120   ;;  %s4443_s0 = inlined_call_operand.vmem [shape: f32[2,40,256], index: 0, kind: input, shape index: {}]   ;;  %s4444_s1 = inlined_call_operand.vmem [shape: f32[2,32], index: 1, kind: input, shape index: {}]   ;;  %s4445_s2 = inlined_call_operand.vmem [shape: bf16[8,40], index: 2, kind: input, shape index: {}]   ;;  %s4446_s3 = inlined_call_operand.vmem [shape: f32[8,256], index: 3, kind: input, shape index: {}]   ;;  %s4447_s4 = inlined_call_operand.vmem [shape: bf16[32,128], index: 4, kind: input, shape index: {}]   ;;  %s4448_s5 = inlined_call_operand.vmem [shape: f32[1,128], index: 5, kind: input, shape index: {}]   ;;  %s4449_s6 = inlined_call_operand.vmem [shape: bf16[8,256,128], index: 6, kind: input, shape index: {}]   ;;  %s4450_s7 = inlined_call_operand.vmem [shape: bf16[128,128], index: 7, kind: input, shape index: {}]   ;;  %s4451_s8 = inlined_call_operand.vmem [shape: f32[1,128], index: 8, kind: input, shape index: {}]   ;;  %s4452_s9 = inlined_call_operand.vmem [shape: bf16[128,128], index: 9, kind: input, shape index: {}]   ;;  %s4453_s10 = inlined_call_operand.vmem [shape: f32[1,128], index: 10, kind: input, shape index: {}]   ;;  %s4454_s11 = inlined_call_operand.hbm [shape: f32[2,128], index: 11, kind: output, shape index: {}]  }
   0x1   :  { %v3064_v0 = vld [vmem:[%s4447_s4] sm:$0xff]   ;;  %3012 = vmatprep.subr.bf16.mxu0 %v4455_v1  ;;  %v3065_v2 = vld [vmem:[%s4447_s4 + $0x8] sm:$0xff]   ;;  %3020 = vmatprep.subr.bf16.mxu1 %v4455_v1  ;;  %v3068_v7 = vld [vmem:[%s4450_s7 + $0x10] sm:$0xff]  }
   0x2   :  { %3013 = vmatpush3.bf16.msra.mxu0 %v3064_v0  ;;  %3016 = vmatprep.mubr.msk.bf16.mxu0 %vm3235_vm0, %v4455_v1  ;;  %v40_v3 = vld [vmem:[%s4444_s1] sm:$0x3]  ;;  %v3067_v5 = vld [vmem:[%s4450_s7 + $0x8] sm:$0xff]   ;;  %v3069_v8 = vld [vmem:[%s4450_s7 + $0x18] sm:$0xff]  }
   0x3   :  { %v3066_v4 = vld [vmem:[%s4450_s7] sm:$0xff]   ;;  %3014 = vmatprep.subr.bf16.mxu0 %v4455_v1  ;;  %3036 = vmatprep.mubr.msk.bf16.mxu1 %vm3235_vm0, %v4455_v1  ;;  %v41_v6 = vpack.c.bf16 %v40_v3, %v40_v3  ;;  %v3071_v10 = vld [vmem:[%s4450_s7 + $0x28] sm:$0xff]   ;;  %v3072_v11 = vld [vmem:[%s4450_s7 + $0x30] sm:$0xff]  }
   0x4   :  { %3021 = vmatpush3.bf16.msra.mxu1 %v3066_v4  ;;  %v3070_v9 = vld [vmem:[%s4450_s7 + $0x20] sm:$0xff]   ;;  %v3073_v12 = vld [vmem:[%s4450_s7 + $0x38] sm:$0xff]   ;;  %v217_v13 = vld [vmem:[%s4443_s0 + $0x8] sm:$0xff] }
   0x5   :  { %3022 = vmatprep.subr.bf16.mxu1 %v4455_v1  ;;  %v219_v14 = vld [vmem:[%s4443_s0 + $0x18] sm:$0xff] }
   0x6   :  { %3015 = vmatpush3.bf16.msra.mxu0 %v3065_v2  ;;  %v227_v15 = vpack.c.bf16 %v219_v14, %v217_v13 }
   0x8   :  { %3023 = vmatpush3.bf16.msra.mxu1 %v3067_v5 }
   0x9   :  { %3017 = vmatmul.mubr.msk.bf16.vlgmr.msra.gmra.mrb[0].mxu0 %vm65_vm1, %v41_v6  ;;  %3024 = vmatprep.subr.bf16.mxu1 %v4455_v1 }
   0xc   :  { %3025 = vmatpush3.bf16.msra.mxu1 %v3068_v7 }
   0xd   :  { %3026 = vmatprep.subr.bf16.mxu1 %v4455_v1 }
  0x10   :  { %3027 = vmatpush3.bf16.msra.mxu1 %v3069_v8 }
  0x11   :  { %3028 = vmatprep.subr.bf16.mxu1 %v4455_v1 }
  0x14   :  { %3029 = vmatpush3.bf16.msra.mxu1 %v3070_v9 }
  0x15   :  { %3030 = vmatprep.subr.bf16.mxu1 %v4455_v1 }
  0x18   :  { %3031 = vmatpush3.bf16.msra.mxu1 %v3071_v10 }
  0x19   :  { %3032 = vmatprep.subr.bf16.mxu1 %v4455_v1 }
  0x1c   :  { %3033 = vmatpush3.bf16.msra.mxu1 %v3072_v11 }
  0x1d   :  { %3034 = vmatprep.subr.bf16.mxu1 %v4455_v1 }
  0x20   :  { %3035 = vmatpush3.bf16.msra.mxu1 %v3073_v12 }
  0x21   :  { %245 = vmatprep.subr.bf16.mxu1 %v227_v15 }
  0x22   :  { %16 = vsyncpa [#allocation3], 0  ;;  %v3354_v16 = vld [vmem:[%s4449_s6 + $0xc0] sm:$0xff]   ;;  %v3366_v18 = vld [vmem:[%s4449_s6 + $0xc8] sm:$0xff]   ;;  %v4457_v41 = vmov 0   ;;  %vm238_vm2 = vcmask 1043456  }
  0x23   :  { %v3359_v17 = vld [vmem:[%s4449_s6 + $0x80] sm:$0xff]   ;;  %2651 = vmatprep.subr.bf16.mxu0 %v3354_v16  ;;  %v3371_v19 = vld [vmem:[%s4449_s6 + $0x88] sm:$0xff]   ;;  %v3378_v20 = vld [vmem:[%s4449_s6 + $0xd0] sm:$0xff]   ;;  %vm234_vm3 = vcmask 326656   ;;  %vm2112_vm4 = vcmask 1040384   ;;  %s3237_s19 = smov [#allocation2]  }
  0x24   :  { %2652 = vmatpush3.bf16.msra.mxu0 %v3359_v17  ;;  %v3383_v21 = vld [vmem:[%s4449_s6 + $0x90] sm:$0xff]   ;;  %v2251_v22 = vld [vmem:[%s4448_s5] ss:$0 sm:$0xff]  ;;  %v221_v29 = vld [vmem:[%s4443_s0 + $0x28] sm:$0xff]  ;;  %s2243_s20 = sshll.u32 %s3237_s19, 4  ;;  %s2244_s20 = int_to_ptr.vmem [resolvable:$true] %s2243_s20 }
  0x25   :  { %2653 = vmatprep.subr.bf16.mxu0 %v3366_v18  ;;  %v216_v26 = vld [vmem:[%s4443_s0] sm:$0xff]  ;;  %v218_v27 = vld [vmem:[%s4443_s0 + $0x10] sm:$0xff]  ;;  %v223_v30 = vld [vmem:[%s4443_s0 + $0x38] sm:$0xff]  ;;  %p3215_p1 = scmp.lt.s32.totalorder %s2244_s20, %s2244_s20 }
  0x26   :  { %v226_v33 = vpack.c.bf16 %v218_v27, %v216_v26  ;;  %v229_v35 = vpack.c.bf16 %v223_v30, %v221_v29  ;;  %v220_v36 = vld [vmem:[%s4443_s0 + $0x20] sm:$0xff]  ;;  %v222_v37 = vld [vmem:[%s4443_s0 + $0x30] sm:$0xff]  ;;  %v225_v38 = vld [vmem:[%s4443_s0 + $0x48] sm:$0xff] }
  0x27   :  { %v224_v39 = vld [vmem:[%s4443_s0 + $0x40] sm:$0xff]  ;;  %v228_v40 = vpack.c.bf16 %v222_v37, %v220_v36  ;;  %v231_v42 = vpack.c.bf16 %v225_v38, %v225_v38  ;;  %v3436_v48 = vld [vmem:[%s4449_s6 + $0x48] sm:$0xff]   ;;  %v3450_v50 = vld [vmem:[%s4449_s6 + $0x50] sm:$0xff]  }
  0x28   :  { %2654 = vmatpush3.bf16.msra.mxu0 %v3371_v19  ;;  %v230_v43 = vpack.c.bf16 %v224_v39, %v224_v39  ;;  %v3420_v45 = vld [vmem:[%s4449_s6 + $0x40] sm:$0xff]   ;;  %v3444_v49 = vld [vmem:[%s4449_s6 + $0x8] sm:$0xff]   ;;  %v3456_v51 = vld [vmem:[%s4449_s6 + $0x10] sm:$0xff]  }
  0x29   :  { %2655 = vmatprep.subr.bf16.mxu0 %v3378_v20  ;;  %v3425_v46 = vld [vmem:[%s4445_s2] sm:$0xf]  ;;  %v3462_v52 = vld [vmem:[%s4449_s6 + $0x58] sm:$0xff]   ;;  %v3508_v60 = vld [vmem:[%s4449_s6 + $0x68] sm:$0xff]  }
  0x2a   :  { %v240_v44 = vsel %vm238_vm2, %v230_v43, 0  ;;  %v3430_v47 = vld [vmem:[%s4449_s6] sm:$0xff]   ;;  %v3469_v53 = vld [vmem:[%s4449_s6 + $0x18] sm:$0xff]   ;;  %v3513_v61 = vld [vmem:[%s4449_s6 + $0xe8] sm:$0xff]  }
  0x2b   :  { %v3474_v54 = vld [vmem:[%s4449_s6 + $0xd8] sm:$0xff]   ;;  %v3486_v56 = vld [vmem:[%s4449_s6 + $0x60] sm:$0xff]   ;;  %v3520_v62 = vld [vmem:[%s4449_s6 + $0x28] sm:$0xff]  }
  0x2c   :  { %2656 = vmatpush3.bf16.msra.mxu0 %v3383_v21  ;;  %v3480_v55 = vld [vmem:[%s4449_s6 + $0x98] sm:$0xff]   ;;  %v3492_v57 = vld [vmem:[%s4449_s6 + $0x20] sm:$0xff]   ;;  %v3527_v63 = vld [vmem:[%s4449_s6 + $0xa8] sm:$0xff]  }
  0x2d   :  { %2657 = vmatprep.subr.bf16.mxu0 %v3474_v54  ;;  %v3497_v58 = vld [vmem:[%s4449_s6 + $0xe0] sm:$0xff]   ;;  %v3534_v0 = vld [vmem:[%s4449_s6 + $0x70] sm:$0xff]   ;;  %v3558_v5 = vld [vmem:[%s4449_s6 + $0x78] sm:$0xff]  }
  0x2e   :  { %v3502_v59 = vld [vmem:[%s4449_s6 + $0xa0] sm:$0xff]   ;;  %v3540_v2 = vld [vmem:[%s4449_s6 + $0x30] sm:$0xff]   ;;  %v3564_v6 = vld [vmem:[%s4449_s6 + $0x38] sm:$0xff]  }
  0x2f   :  { %v3546_v3 = vld [vmem:[%s4449_s6 + $0xf0] sm:$0xff]   ;;  %v3570_v7 = vld [vmem:[%s4449_s6 + $0xf8] sm:$0xff]   ;;  %v3582_v9 = vld [vmem:[%s4449_s6 + $0x1c0] sm:$0xff]  }
  0x30   :  { %2658 = vmatpush3.bf16.msra.mxu0 %v3480_v55  ;;  %v3552_v4 = vld [vmem:[%s4449_s6 + $0xb0] sm:$0xff]   ;;  %v3576_v8 = vld [vmem:[%s4449_s6 + $0xb8] sm:$0xff]   ;;  %v3589_v10 = vld [vmem:[%s4449_s6 + $0x140] sm:$0xff]  }
  0x31   :  { %2659 = vmatprep.subr.bf16.mxu0 %v3497_v58  ;;  %v3597_v15 = vld [vmem:[%s4446_s3] sm:$0xff]  ;;  %v3636_v38 = vld [vmem:[%s4449_s6 + $0x148] sm:$0xff]   ;;  %v3652_v43 = vld [vmem:[%s4449_s6 + $0x1d0] sm:$0xff]  }
  0x32   :  { %v3627_v36 = vld [vmem:[%s4449_s6 + $0x100] sm:$0xff]   ;;  %v3742_v1 = vld [vmem:[%s4449_s6 + $0x1a8] sm:$0xff]  }
  0x33   :  { %4546 = vst [vmem:[#allocation13_spill] sm:$0xff] %v3742_v1 }
  0x34   :  { %2660 = vmatpush3.bf16.msra.mxu0 %v3502_v59 }
  0x35   :  { %2661 = vmatprep.subr.bf16.mxu0 %v3513_v61 }
  0x38   :  { %2662 = vmatpush3.bf16.msra.mxu0 %v3527_v63 }
  0x39   :  { %2663 = vmatprep.subr.bf16.mxu0 %v3546_v3 }
  0x3c   :  { %2664 = vmatpush3.bf16.msra.mxu0 %v3552_v4 }
  0x3d   :  { %2665 = vmatprep.subr.bf16.mxu0 %v3570_v7 }
  0x40   :  { %2666 = vmatpush3.bf16.msra.mxu0 %v3576_v8 }
  0x41   :  { %2695 = vmatprep.subr.bf16.mxu0 %v3589_v10 }
  0xdc   :  { %v103_v23 = vpop.f32.mrb[0].mxu0 }
  0xdd   :  { %v104_v24 = vadd.f32 %v2251_v22, %v103_v23  ;;  %v3018_v25 = vpop.f32.mrb[1].mxu0  ;;  %v3602_v22 = vld [vmem:[%s4446_s3 + $0x8] sm:$0xff] }
  0xde   :  { %v106_v28 = vpop.f32.mrb[2].mxu0 }
  0xdf   :  { %v109_v31 = vmax.f32 %v104_v24, 0.0  ;;  %v3019_v32 = vpop.f32.mrb[3].mxu0 }
  0xe1   :  { %v110_v34 = vpack.c.bf16 %v109_v31, %v109_v31 }
  0xe3   :  { %3037 = vmatmul.mubr.bf16.vlgmr.msra.gmra.mrb[0].mxu1 %v110_v34  ;;  %v3618_v34 = vld [vmem:[%s4449_s6 + $0x1c8] sm:$0xff]  }
  0xe4   :  { %246 = vmatpush1.bf16.msra.mxu1 %v226_v33  ;;  %277 = vmatprep.mubr.bf16.mxu1 %v4457_v41  ;;  %v3613_v33 = vld [vmem:[%s4449_s6 + $0x180] sm:$0xff]   ;;  %v3748_v41 = vld [vmem:[%s4449_s6 + $0x1f0] sm:$0xff]  }
  0xe5   :  { %247 = vmatprep.subr.bf16.mxu1 %v229_v35  ;;  %4547 = vst [vmem:[#allocation14_spill] sm:$0xff] %v3748_v41 }
  0xe8   :  { %248 = vmatpush1.bf16.msra.mxu1 %v228_v40 }
  0xe9   :  { %2263 = vmatprep.subr.msk.bf16.mxu1 %vm238_vm2, %v231_v42  ;;  %v3645_v42 = vld [vmem:[%s4449_s6 + $0x188] sm:$0xff]  }
  0xec   :  { %250 = vmatpush1.bf16.msra.mxu1 %v240_v44  ;;  %v3658_v44 = vld [vmem:[%s4449_s6 + $0x108] sm:$0xff]  }
  0xed   :  { %2673 = vmatprep.subr.bf16.mxu1 %v3420_v45 }
  0xef   :  { %2264 = vmatmul.mubr.msk.bf16.vlgmr.msra.gmra.mrb[4].mxu1 %vm234_vm3, %v3425_v46 }
  0xf0   :  { %2674 = vmatpush3.bf16.msra.mxu1 %v3430_v47 }
  0xf1   :  { %2675 = vmatprep.subr.bf16.mxu1 %v3436_v48 }
  0xf4   :  { %2676 = vmatpush3.bf16.msra.mxu1 %v3444_v49 }
  0xf5   :  { %2677 = vmatprep.subr.bf16.mxu1 %v3450_v50 }
  0xf8   :  { %2678 = vmatpush3.bf16.msra.mxu1 %v3456_v51 }
  0xf9   :  { %2679 = vmatprep.subr.bf16.mxu1 %v3462_v52 }
  0xfc   :  { %2680 = vmatpush3.bf16.msra.mxu1 %v3469_v53 }
  0xfd   :  { %2681 = vmatprep.subr.bf16.mxu1 %v3486_v56 }
 0x100   :  { %2682 = vmatpush3.bf16.msra.mxu1 %v3492_v57 }
 0x101   :  { %2683 = vmatprep.subr.bf16.mxu1 %v3508_v60 }
 0x104   :  { %2684 = vmatpush3.bf16.msra.mxu1 %v3520_v62 }
 0x105   :  { %2685 = vmatprep.subr.bf16.mxu1 %v3534_v0 }
 0x108   :  { %2686 = vmatpush3.bf16.msra.mxu1 %v3540_v2 }
 0x109   :  { %2687 = vmatprep.subr.bf16.mxu1 %v3558_v5 }
 0x10c   :  { %2688 = vmatpush3.bf16.msra.mxu1 %v3564_v6 }
 0x10d   :  { %2717 = vmatprep.subr.bf16.mxu1 %v3582_v9 }
 0x1b6   :  { %v3592_v11 = vpop.f32.mrb[0].mxu1 }
 0x1b7   :  { %4538 = vst [vmem:[#allocation5_spill] sm:$0xff] %v3592_v11  ;;  %v3038_v12 = vpop.f32.mrb[1].mxu1  ;;  %v3754_v11 = vld [vmem:[%s4449_s6 + $0x128] sm:$0xff]  }
 0x1b8   :  { %v212_v13 = vpop.f32.mrb[2].mxu1  ;;  %v3664_v12 = vld [vmem:[%s4449_s6 + $0x150] sm:$0xff]   ;;  %4548 = vst [vmem:[#allocation15_spill] sm:$0xff] %v3754_v11 }
 0x1b9   :  { %v3039_v14 = vpop.f32.mrb[3].mxu1  ;;  %v3670_v13 = vld [vmem:[%s4449_s6 + $0x190] sm:$0xff]  }
 0x1ba   :  { %v3676_v14 = vld [vmem:[%s4449_s6 + $0x1d8] sm:$0xff]  }
 0x1c2   :  { %v279_v23 = vpop.f32.mrb[4].mxu1 }
 0x1c3   :  { %v280_v24 = vadd.f32 %v279_v23, %v3597_v15  ;;  %v281_v25 = vpop.f32.mrb[5].mxu1  ;;  %v3682_v23 = vld [vmem:[%s4449_s6 + $0x110] sm:$0xff]  }
 0x1c4   :  { %v282_v26 = vadd.f32 %v281_v25, %v3602_v22  ;;  %v283_v27 = vpop.f32.mrb[6].mxu1  ;;  %v3694_v25 = vld [vmem:[%s4449_s6 + $0x198] sm:$0xff]  }
 0x1c5   :  { %v286_v28 = vmax.f32 %v280_v24, 0.0  ;;  %v284_v29 = vpop.f32.mrb[7].mxu1  ;;  %v3688_v24 = vld [vmem:[%s4449_s6 + $0x158] sm:$0xff]  }
 0x1c6   :  { %v287_v30 = vmax.f32 %v282_v26, 0.0  ;;  %v3700_v26 = vld [vmem:[%s4449_s6 + $0x1e0] sm:$0xff]   ;;  %v3706_v27 = vld [vmem:[%s4449_s6 + $0x118] sm:$0xff]  }
 0x1c7   :  { %v3606_v31 = vpack.c.bf16 %v286_v28, %v286_v28  ;;  %4539 = vst [vmem:[#allocation6_spill] sm:$0xff] %v3700_v26  ;;  %4540 = vst [vmem:[#allocation7_spill] sm:$0xff] %v3706_v27  ;;  %v3712_v28 = vld [vmem:[%s4449_s6 + $0x160] sm:$0xff]  }
 0x1c8   :  { %v3608_v32 = vpack.c.bf16 %v287_v30, %v287_v30  ;;  %4541 = vst [vmem:[#allocation8_spill] sm:$0xff] %v3712_v28  ;;  %v3718_v29 = vld [vmem:[%s4449_s6 + $0x1a0] sm:$0xff]   ;;  %v3724_v30 = vld [vmem:[%s4449_s6 + $0x1e8] sm:$0xff]  }
 0x1c9   :  { %v3631_v37 = vshrl.u32 %v3606_v31, 16  ;;  %4542 = vst [vmem:[#allocation9_spill] sm:$0xff] %v3718_v29  ;;  %4543 = vst [vmem:[#allocation10_spill] sm:$0xff] %v3724_v30 }
 0x1ca   :  { %627 = vmatprep.mubr.bf16.mxu1 %v3608_v32  ;;  %v3622_v35 = vshrl.u32 %v3608_v32, 16  ;;  %v671_v39 = vrot.slane %v3608_v32, 1 }
 0x1cb   :  { %628 = vmatmul.mubr.bf16.vlgmr.msra.gmra.mrb[8].mxu1 %v3606_v31 }
 0x1cc   :  { %2718 = vmatpush3.bf16.msra.mxu1 %v3613_v33  ;;  %491 = vmatprep.mubr.bf16.mxu0 %v3622_v35  ;;  %v845_v40 = vrot.slane %v3622_v35, 1 }
 0x1cd   :  { %492 = vmatmul.mubr.bf16.vlgmr.msra.gmra.mrb[4].mxu0 %v3631_v37  ;;  %2719 = vmatprep.subr.bf16.mxu1 %v3618_v34 }
 0x1ce   :  { %2696 = vmatpush3.bf16.msra.mxu0 %v3627_v36  ;;  %802 = vmatprep.mubr.bf16.mxu0 %v671_v39  ;;  %v3730_v39 = vld [vmem:[%s4449_s6 + $0x120] sm:$0xff]  }
 0x1cf   :  { %976 = vmatprep.mubr.bf16.mxu1 %v845_v40  ;;  %2697 = vmatprep.subr.bf16.mxu0 %v3636_v38  ;;  %4544 = vst [vmem:[#allocation11_spill] sm:$0xff] %v3730_v39  ;;  %v3736_v40 = vld [vmem:[%s4449_s6 + $0x168] sm:$0xff]  }
 0x1d0   :  { %2720 = vmatpush3.bf16.msra.mxu1 %v3645_v42  ;;  %4545 = vst [vmem:[#allocation12_spill] sm:$0xff] %v3736_v40 }
 0x1d1   :  { %2721 = vmatprep.subr.bf16.mxu1 %v3652_v43 }
 0x1d2   :  { %2698 = vmatpush3.bf16.msra.mxu0 %v3658_v44 }
 0x1d3   :  { %2699 = vmatprep.subr.bf16.mxu0 %v3664_v12 }
 0x1d4   :  { %2722 = vmatpush3.bf16.msra.mxu1 %v3670_v13 }
 0x1d5   :  { %2723 = vmatprep.subr.bf16.mxu1 %v3676_v14 }
 0x1d6   :  { %2700 = vmatpush3.bf16.msra.mxu0 %v3682_v23 }
 0x1d7   :  { %2701 = vmatprep.subr.bf16.mxu0 %v3688_v24 }
 0x1d8   :  { %2724 = vmatpush3.bf16.msra.mxu1 %v3694_v25 }
 0x1d9   :  { %2725 = vmatprep.subr.bf16.mxu1 %v3700_v26  ;;  %v3842_v26 = vld [vmem:[%s4449_s6 + $0x288] sm:$0xff]  }
 0x1da   :  { %2702 = vmatpush3.bf16.msra.mxu0 %v3706_v27  ;;  %v670_v27 = vrot.slane %v3606_v31, 1  ;;  %4562 = vst [vmem:[#allocation29_spill] sm:$0xff] %v3842_v26 }
 0x1db   :  { %2703 = vmatprep.subr.bf16.mxu0 %v3712_v28  ;;  %v1193_v28 = vrot.slane %v3622_v35, 2 }
 0x1dc   :  { %2726 = vmatpush3.bf16.msra.mxu1 %v3718_v29  ;;  %v3760_v29 = vld [vmem:[%s4449_s6 + $0x170] sm:$0xff]  }
 0x1dd   :  { %2727 = vmatprep.subr.bf16.mxu1 %v3724_v30  ;;  %4549 = vst [vmem:[#allocation16_spill] sm:$0xff] %v3760_v29  ;;  %v3766_v30 = vld [vmem:[%s4449_s6 + $0x1b0] sm:$0xff]  }
 0x1de   :  { %2704 = vmatpush3.bf16.msra.mxu0 %v3730_v39  ;;  %4550 = vst [vmem:[#allocation17_spill] sm:$0xff] %v3766_v30  ;;  %v3772_v39 = vld [vmem:[%s4449_s6 + $0x1f8] sm:$0xff]  }
 0x1df   :  { %2705 = vmatprep.subr.bf16.mxu0 %v3736_v40  ;;  %4551 = vst [vmem:[#allocation18_spill] sm:$0xff] %v3772_v39  ;;  %v3778_v40 = vld [vmem:[%s4449_s6 + $0x130] sm:$0xff]  }
 0x1e0   :  { %2728 = vmatpush3.bf16.msra.mxu1 %v3742_v1  ;;  %4552 = vst [vmem:[#allocation19_spill] sm:$0xff] %v3778_v40  ;;  %v3784_v1 = vld [vmem:[%s4449_s6 + $0x178] sm:$0xff]  }
 0x1e1   :  { %2729 = vmatprep.subr.bf16.mxu1 %v3748_v41  ;;  %4553 = vst [vmem:[#allocation20_spill] sm:$0xff] %v3784_v1  ;;  %v3790_v41 = vld [vmem:[%s4449_s6 + $0x1b8] sm:$0xff]  }
 0x1e2   :  { %2706 = vmatpush3.bf16.msra.mxu0 %v3754_v11  ;;  %4554 = vst [vmem:[#allocation21_spill] sm:$0xff] %v3790_v41  ;;  %v3796_v11 = vld [vmem:[%s4449_s6 + $0x2c0] sm:$0xff]  }
 0x1e3   :  { %2707 = vmatprep.subr.bf16.mxu0 %v3760_v29  ;;  %4555 = vst [vmem:[#allocation22_spill] sm:$0xff] %v3796_v11  ;;  %v3802_v29 = vld [vmem:[%s4449_s6 + $0x138] sm:$0xff]  }
 0x1e4   :  { %2730 = vmatpush3.bf16.msra.mxu1 %v3766_v30  ;;  %4556 = vst [vmem:[#allocation23_spill] sm:$0xff] %v3802_v29  ;;  %v3808_v30 = vld [vmem:[%s4449_s6 + $0x240] sm:$0xff]  }
 0x1e5   :  { %2731 = vmatprep.subr.bf16.mxu1 %v3772_v39  ;;  %4557 = vst [vmem:[#allocation24_spill] sm:$0xff] %v3808_v30  ;;  %v3814_v39 = vld [vmem:[%s4449_s6 + $0x280] sm:$0xff]  }
 0x1e6   :  { %2708 = vmatpush3.bf16.msra.mxu0 %v3778_v40  ;;  %4558 = vst [vmem:[#allocation25_spill] sm:$0xff] %v3814_v39  ;;  %v844_v40 = vrot.slane %v3631_v37, 1 }
 0x1e7   :  { %2709 = vmatprep.subr.bf16.mxu0 %v3784_v1  ;;  %v3821_v1 = vld [vmem:[%s4449_s6 + $0x2c8] sm:$0xff]  }
 0x1e8   :  { %2732 = vmatpush3.bf16.msra.mxu1 %v3790_v41  ;;  %4559 = vst [vmem:[#allocation26_spill] sm:$0xff] %v3821_v1  ;;  %v3828_v41 = vld [vmem:[%s4449_s6 + $0x200] sm:$0xff]  }
 0x1e9   :  { %2761 = vmatprep.subr.bf16.mxu1 %v3796_v11  ;;  %4560 = vst [vmem:[#allocation27_spill] sm:$0xff] %v3828_v41  ;;  %v3835_v11 = vld [vmem:[%s4449_s6 + $0x248] sm:$0xff]  }
 0x1ea   :  { %2710 = vmatpush3.bf16.msra.mxu0 %v3802_v29  ;;  %4561 = vst [vmem:[#allocation28_spill] sm:$0xff] %v3835_v11  ;;  %v1019_v29 = vrot.slane %v3608_v32, 2 }
 0x1eb   :  { %977 = vmatmul.mubr.bf16.vlgmr.msra.gmra.mrb[12].mxu1 %v844_v40  ;;  %2739 = vmatprep.subr.bf16.mxu0 %v3808_v30  ;;  %v3848_v40 = vld [vmem:[%s4449_s6 + $0x2d0] sm:$0xff]   ;;  %v2623_v30 = vld [vmem:[%s4443_s0 + $0x80] sm:$0xff] }
 0x1ec   :  { %2762 = vmatpush3.bf16.msra.mxu1 %v3814_v39  ;;  %1324 = vmatprep.mubr.bf16.mxu1 %v1193_v28  ;;  %4563 = vst [vmem:[#allocation30_spill] sm:$0xff] %v3848_v40  ;;  %v3854_v28 = vld [vmem:[%s4449_s6 + $0x208] sm:$0xff]   ;;  %v1018_v39 = vrot.slane %v3606_v31, 2 }
 0x1ed   :  { %803 = vmatmul.mubr.bf16.vlgmr.msra.gmra.mrb[8].mxu0 %v670_v27  ;;  %2763 = vmatprep.subr.bf16.mxu1 %v3821_v1  ;;  %4564 = vst [vmem:[#allocation31_spill] sm:$0xff] %v3854_v28  ;;  %v3860_v27 = vld [vmem:[%s4449_s6 + $0x250] sm:$0xff]  }
 0x1ee   :  { %2740 = vmatpush3.bf16.msra.mxu0 %v3828_v41  ;;  %1150 = vmatprep.mubr.bf16.mxu0 %v1019_v29  ;;  %4565 = vst [vmem:[#allocation32_spill] sm:$0xff] %v3860_v27  ;;  %v3866_v1 = vld [vmem:[%s4449_s6 + $0x290] sm:$0xff]   ;;  %v3872_v29 = vld [vmem:[%s4449_s6 + $0x2d8] sm:$0xff]   ;;  %v1541_v41 = vrot.slane %v3622_v35, 3  ;;  %v1367_v35 = vrot.slane %v3608_v32, 3 }
 0x1ef   :  { %2741 = vmatprep.subr.bf16.mxu0 %v3835_v11  ;;  %4566 = vst [vmem:[#allocation33_spill] sm:$0xff] %v3866_v1  ;;  %4567 = vst [vmem:[#allocation34_spill] sm:$0xff] %v3872_v29  ;;  %v3878_v11 = vld [vmem:[%s4449_s6 + $0x210] sm:$0xff]  }
 0x1f0   :  { %2764 = vmatpush3.bf16.msra.mxu1 %v3842_v26  ;;  %4568 = vst [vmem:[#allocation35_spill] sm:$0xff] %v3878_v11  ;;  %v3884_v26 = vld [vmem:[%s4449_s6 + $0x258] sm:$0xff]   ;;  %v4056_v32 = vld [vmem:[%s4449_s6 + $0x350] sm:$0xff]  }
 0x1f1   :  { %2765 = vmatprep.subr.bf16.mxu1 %v3848_v40  ;;  %4569 = vst [vmem:[#allocation36_spill] sm:$0xff] %v3884_v26  ;;  %v3890_v40 = vld [vmem:[%s4449_s6 + $0x298] sm:$0xff]   ;;  %4597 = vst [vmem:[#allocation64_spill] sm:$0xff] %v4056_v32 }
 0x1f2   :  { %2742 = vmatpush3.bf16.msra.mxu0 %v3854_v28  ;;  %4570 = vst [vmem:[#allocation37_spill] sm:$0xff] %v3890_v40  ;;  %v3896_v28 = vld [vmem:[%s4449_s6 + $0x2e0] sm:$0xff]  }
 0x1f3   :  { %2743 = vmatprep.subr.bf16.mxu0 %v3860_v27  ;;  %4571 = vst [vmem:[#allocation38_spill] sm:$0xff] %v3896_v28  ;;  %v3902_v27 = vld [vmem:[%s4449_s6 + $0x218] sm:$0xff]  }
 0x1f4   :  { %2766 = vmatpush3.bf16.msra.mxu1 %v3866_v1  ;;  %4572 = vst [vmem:[#allocation39_spill] sm:$0xff] %v3902_v27  ;;  %v3908_v1 = vld [vmem:[%s4449_s6 + $0x260] sm:$0xff]  }
 0x1f5   :  { %2767 = vmatprep.subr.bf16.mxu1 %v3872_v29  ;;  %4573 = vst [vmem:[#allocation40_spill] sm:$0xff] %v3908_v1  ;;  %v3914_v29 = vld [vmem:[%s4449_s6 + $0x2a0] sm:$0xff]  }
 0x1f6   :  { %2744 = vmatpush3.bf16.msra.mxu0 %v3878_v11  ;;  %4574 = vst [vmem:[#allocation41_spill] sm:$0xff] %v3914_v29  ;;  %v3920_v11 = vld [vmem:[%s4449_s6 + $0x2e8] sm:$0xff]  }
 0x1f7   :  { %2745 = vmatprep.subr.bf16.mxu0 %v3884_v26  ;;  %4575 = vst [vmem:[#allocation42_spill] sm:$0xff] %v3920_v11  ;;  %v3926_v26 = vld [vmem:[%s4449_s6 + $0x220] sm:$0xff]  }
 0x1f8   :  { %2768 = vmatpush3.bf16.msra.mxu1 %v3890_v40  ;;  %4576 = vst [vmem:[#allocation43_spill] sm:$0xff] %v3926_v26  ;;  %v3932_v40 = vld [vmem:[%s4449_s6 + $0x268] sm:$0xff]  }
 0x1f9   :  { %2769 = vmatprep.subr.bf16.mxu1 %v3896_v28  ;;  %4577 = vst [vmem:[#allocation44_spill] sm:$0xff] %v3932_v40  ;;  %v3938_v28 = vld [vmem:[%s4449_s6 + $0x2a8] sm:$0xff]  }
 0x1fa   :  { %2746 = vmatpush3.bf16.msra.mxu0 %v3902_v27  ;;  %4578 = vst [vmem:[#allocation45_spill] sm:$0xff] %v3938_v28  ;;  %v3944_v27 = vld [vmem:[%s4449_s6 + $0x2f0] sm:$0xff]  }
 0x1fb   :  { %2747 = vmatprep.subr.bf16.mxu0 %v3908_v1  ;;  %4579 = vst [vmem:[#allocation46_spill] sm:$0xff] %v3944_v27  ;;  %v3950_v1 = vld [vmem:[%s4449_s6 + $0x228] sm:$0xff]  }
 0x1fc   :  { %2770 = vmatpush3.bf16.msra.mxu1 %v3914_v29  ;;  %4580 = vst [vmem:[#allocation47_spill] sm:$0xff] %v3950_v1  ;;  %v3956_v29 = vld [vmem:[%s4449_s6 + $0x270] sm:$0xff]  }
 0x1fd   :  { %2771 = vmatprep.subr.bf16.mxu1 %v3920_v11  ;;  %4581 = vst [vmem:[#allocation48_spill] sm:$0xff] %v3956_v29  ;;  %v3962_v11 = vld [vmem:[%s4449_s6 + $0x2b0] sm:$0xff]  }
 0x1fe   :  { %2748 = vmatpush3.bf16.msra.mxu0 %v3926_v26  ;;  %4582 = vst [vmem:[#allocation49_spill] sm:$0xff] %v3962_v11  ;;  %v3968_v26 = vld [vmem:[%s4449_s6 + $0x2f8] sm:$0xff]  }
 0x1ff   :  { %2749 = vmatprep.subr.bf16.mxu0 %v3932_v40  ;;  %4583 = vst [vmem:[#allocation50_spill] sm:$0xff] %v3968_v26  ;;  %v3974_v40 = vld [vmem:[%s4449_s6 + $0x230] sm:$0xff]  }
 0x200   :  { %2772 = vmatpush3.bf16.msra.mxu1 %v3938_v28  ;;  %4584 = vst [vmem:[#allocation51_spill] sm:$0xff] %v3974_v40  ;;  %v3980_v28 = vld [vmem:[%s4449_s6 + $0x278] sm:$0xff]  }
 0x201   :  { %2773 = vmatprep.subr.bf16.mxu1 %v3944_v27  ;;  %4585 = vst [vmem:[#allocation52_spill] sm:$0xff] %v3980_v28  ;;  %v3986_v27 = vld [vmem:[%s4449_s6 + $0x2b8] sm:$0xff]  }
 0x202   :  { %2750 = vmatpush3.bf16.msra.mxu0 %v3950_v1  ;;  %4586 = vst [vmem:[#allocation53_spill] sm:$0xff] %v3986_v27  ;;  %v3992_v1 = vld [vmem:[%s4449_s6 + $0x3c0] sm:$0xff]  }
 0x203   :  { %2751 = vmatprep.subr.bf16.mxu0 %v3956_v29  ;;  %4587 = vst [vmem:[#allocation54_spill] sm:$0xff] %v3992_v1  ;;  %v3998_v29 = vld [vmem:[%s4449_s6 + $0x238] sm:$0xff]  }
 0x204   :  { %2774 = vmatpush3.bf16.msra.mxu1 %v3962_v11  ;;  %4588 = vst [vmem:[#allocation55_spill] sm:$0xff] %v3998_v29  ;;  %v4004_v11 = vld [vmem:[%s4449_s6 + $0x340] sm:$0xff]  }
 0x205   :  { %2775 = vmatprep.subr.bf16.mxu1 %v3968_v26  ;;  %4589 = vst [vmem:[#allocation56_spill] sm:$0xff] %v4004_v11  ;;  %v4010_v26 = vld [vmem:[%s4449_s6 + $0x380] sm:$0xff]  }
 0x206   :  { %2752 = vmatpush3.bf16.msra.mxu0 %v3974_v40  ;;  %4590 = vst [vmem:[#allocation57_spill] sm:$0xff] %v4010_v26  ;;  %v1192_v40 = vrot.slane %v3631_v37, 2 }
 0x207   :  { %2753 = vmatprep.subr.bf16.mxu0 %v3980_v28  ;;  %v4017_v28 = vld [vmem:[%s4449_s6 + $0x3c8] sm:$0xff]  }
 0x208   :  { %2776 = vmatpush3.bf16.msra.mxu1 %v3986_v27  ;;  %4591 = vst [vmem:[#allocation58_spill] sm:$0xff] %v4017_v28  ;;  %v4024_v27 = vld [vmem:[%s4449_s6 + $0x300] sm:$0xff]  }
 0x209   :  { %2805 = vmatprep.subr.bf16.mxu1 %v3992_v1  ;;  %4592 = vst [vmem:[#allocation59_spill] sm:$0xff] %v4024_v27  ;;  %v4031_v1 = vld [vmem:[%s4449_s6 + $0x348] sm:$0xff]  }
 0x20a   :  { %2754 = vmatpush3.bf16.msra.mxu0 %v3998_v29  ;;  %4593 = vst [vmem:[#allocation60_spill] sm:$0xff] %v4031_v1  ;;  %v4038_v29 = vld [vmem:[%s4449_s6 + $0x388] sm:$0xff]  }
 0x20b   :  { %1325 = vmatmul.mubr.bf16.vlgmr.msra.gmra.mrb[16].mxu1 %v1192_v40  ;;  %2783 = vmatprep.subr.bf16.mxu0 %v4004_v11  ;;  %4594 = vst [vmem:[#allocation61_spill] sm:$0xff] %v4038_v29  ;;  %v4044_v40 = vld [vmem:[%s4449_s6 + $0x3d0] sm:$0xff]  }
 0x20c   :  { %2806 = vmatpush3.bf16.msra.mxu1 %v4010_v26  ;;  %1672 = vmatprep.mubr.bf16.mxu1 %v1541_v41  ;;  %4595 = vst [vmem:[#allocation62_spill] sm:$0xff] %v4044_v40  ;;  %v4050_v41 = vld [vmem:[%s4449_s6 + $0x308] sm:$0xff]   ;;  %v2619_v26 = vld [vmem:[%s4443_s0 + $0x60] sm:$0xff]  ;;  %v2621_v11 = vld [vmem:[%s4443_s0 + $0x70] sm:$0xff] }
 0x20d   :  { %1151 = vmatmul.mubr.bf16.vlgmr.msra.gmra.mrb[12].mxu0 %v1018_v39  ;;  %2807 = vmatprep.subr.bf16.mxu1 %v4017_v28  ;;  %4596 = vst [vmem:[#allocation63_spill] sm:$0xff] %v4050_v41  ;;  %v4062_v39 = vld [vmem:[%s4449_s6 + $0x390] sm:$0xff]  }
 0x20e   :  { %2784 = vmatpush3.bf16.msra.mxu0 %v4024_v27  ;;  %1498 = vmatprep.mubr.bf16.mxu0 %v1367_v35  ;;  %4598 = vst [vmem:[#allocation65_spill] sm:$0xff] %v4062_v39  ;;  %v4068_v35 = vld [vmem:[%s4449_s6 + $0x3d8] sm:$0xff]   ;;  %v2617_v28 = vld [vmem:[%s4443_s0 + $0x50] sm:$0xff] }
 0x20f   :  { %2785 = vmatprep.subr.bf16.mxu0 %v4031_v1  ;;  %4599 = vst [vmem:[#allocation66_spill] sm:$0xff] %v4068_v35  ;;  %v4074_v1 = vld [vmem:[%s4449_s6 + $0x310] sm:$0xff]  }
 0x210   :  { %2808 = vmatpush3.bf16.msra.mxu1 %v4038_v29  ;;  %4600 = vst [vmem:[#allocation67_spill] sm:$0xff] %v4074_v1  ;;  %v4080_v29 = vld [vmem:[%s4449_s6 + $0x358] sm:$0xff]  }
 0x211   :  { %2809 = vmatprep.subr.bf16.mxu1 %v4044_v40  ;;  %4601 = vst [vmem:[#allocation68_spill] sm:$0xff] %v4080_v29  ;;  %v4086_v40 = vld [vmem:[%s4449_s6 + $0x398] sm:$0xff]  }
 0x212   :  { %2786 = vmatpush3.bf16.msra.mxu0 %v4050_v41  ;;  %4602 = vst [vmem:[#allocation69_spill] sm:$0xff] %v4086_v40  ;;  %v4092_v41 = vld [vmem:[%s4449_s6 + $0x3e0] sm:$0xff]  }
 0x213   :  { %2787 = vmatprep.subr.bf16.mxu0 %v4056_v32  ;;  %4603 = vst [vmem:[#allocation70_spill] sm:$0xff] %v4092_v41  ;;  %v4098_v32 = vld [vmem:[%s4449_s6 + $0x318] sm:$0xff]  }
 0x214   :  { %2810 = vmatpush3.bf16.msra.mxu1 %v4062_v39  ;;  %4604 = vst [vmem:[#allocation71_spill] sm:$0xff] %v4098_v32  ;;  %v4104_v39 = vld [vmem:[%s4449_s6 + $0x360] sm:$0xff]  }
 0x215   :  { %2811 = vmatprep.subr.bf16.mxu1 %v4068_v35  ;;  %4605 = vst [vmem:[#allocation72_spill] sm:$0xff] %v4104_v39  ;;  %v4110_v35 = vld [vmem:[%s4449_s6 + $0x3a0] sm:$0xff]  }
 0x216   :  { %2788 = vmatpush3.bf16.msra.mxu0 %v4074_v1  ;;  %4606 = vst [vmem:[#allocation73_spill] sm:$0xff] %v4110_v35  ;;  %v4116_v1 = vld [vmem:[%s4449_s6 + $0x3e8] sm:$0xff]  }
 0x217   :  { %2789 = vmatprep.subr.bf16.mxu0 %v4080_v29  ;;  %4607 = vst [vmem:[#allocation74_spill] sm:$0xff] %v4116_v1  ;;  %v4122_v29 = vld [vmem:[%s4449_s6 + $0x320] sm:$0xff]  }
 0x218   :  { %2812 = vmatpush3.bf16.msra.mxu1 %v4086_v40  ;;  %4608 = vst [vmem:[#allocation75_spill] sm:$0xff] %v4122_v29  ;;  %v4128_v40 = vld [vmem:[%s4449_s6 + $0x368] sm:$0xff]  }
 0x219   :  { %2813 = vmatprep.subr.bf16.mxu1 %v4092_v41  ;;  %4609 = vst [vmem:[#allocation76_spill] sm:$0xff] %v4128_v40  ;;  %v4134_v41 = vld [vmem:[%s4449_s6 + $0x3a8] sm:$0xff]  }
 0x21a   :  { %2790 = vmatpush3.bf16.msra.mxu0 %v4098_v32  ;;  %4610 = vst [vmem:[#allocation77_spill] sm:$0xff] %v4134_v41  ;;  %v4140_v32 = vld [vmem:[%s4449_s6 + $0x3f0] sm:$0xff]  }
 0x21b   :  { %2791 = vmatprep.subr.bf16.mxu0 %v4104_v39  ;;  %4611 = vst [vmem:[#allocation78_spill] sm:$0xff] %v4140_v32  ;;  %v4146_v39 = vld [vmem:[%s4449_s6 + $0x328] sm:$0xff]  }
 0x21c   :  { %2814 = vmatpush3.bf16.msra.mxu1 %v4110_v35  ;;  %4612 = vst [vmem:[#allocation79_spill] sm:$0xff] %v4146_v39  ;;  %v4152_v35 = vld [vmem:[%s4449_s6 + $0x370] sm:$0xff]  }
 0x21d   :  { %2815 = vmatprep.subr.bf16.mxu1 %v4116_v1  ;;  %4613 = vst [vmem:[#allocation80_spill] sm:$0xff] %v4152_v35  ;;  %v4158_v1 = vld [vmem:[%s4449_s6 + $0x3b0] sm:$0xff]  }
 0x21e   :  { %2792 = vmatpush3.bf16.msra.mxu0 %v4122_v29  ;;  %4614 = vst [vmem:[#allocation81_spill] sm:$0xff] %v4158_v1  ;;  %v4164_v29 = vld [vmem:[%s4449_s6 + $0x3f8] sm:$0xff]  }
 0x21f   :  { %2793 = vmatprep.subr.bf16.mxu0 %v4128_v40  ;;  %4615 = vst [vmem:[#allocation82_spill] sm:$0xff] %v4164_v29  ;;  %v4170_v40 = vld [vmem:[%s4449_s6 + $0x330] sm:$0xff]  }
 0x220   :  { %2816 = vmatpush3.bf16.msra.mxu1 %v4134_v41  ;;  %4616 = vst [vmem:[#allocation83_spill] sm:$0xff] %v4170_v40  ;;  %v4176_v41 = vld [vmem:[%s4449_s6 + $0x378] sm:$0xff]  }
 0x221   :  { %2817 = vmatprep.subr.bf16.mxu1 %v4140_v32  ;;  %4617 = vst [vmem:[#allocation84_spill] sm:$0xff] %v4176_v41  ;;  %v4182_v32 = vld [vmem:[%s4449_s6 + $0x3b8] sm:$0xff]  }
 0x222   :  { %2794 = vmatpush3.bf16.msra.mxu0 %v4146_v39  ;;  %4618 = vst [vmem:[#allocation85_spill] sm:$0xff] %v4182_v32  ;;  %v2618_v39 = vld [vmem:[%s4443_s0 + $0x58] sm:$0xff] }
 0x223   :  { %2795 = vmatprep.subr.bf16.mxu0 %v4152_v35  ;;  %v2620_v35 = vld [vmem:[%s4443_s0 + $0x68] sm:$0xff] }
 0x224   :  { %2818 = vmatpush3.bf16.msra.mxu1 %v4158_v1  ;;  %v4195_v1 = vld [vmem:[%s4449_s6 + $0x338] sm:$0xff]   ;;  %v1693_v27 = vpack.c.bf16 %v2620_v35, %v2618_v39  ;;  %v1540_v39 = vrot.slane %v3631_v37, 3  ;;  %v1692_v35 = vpack.c.bf16 %v2619_v26, %v2617_v28  ;;  %v2625_v37 = vld [vmem:[%s4443_s0 + $0x90] sm:$0xff]  ;;  %v4619_v26 = vmov 0  }
 0x225   :  { %2819 = vmatprep.subr.bf16.mxu1 %v4164_v29  ;;  %v2624_v29 = vld [vmem:[%s4443_s0 + $0x88] sm:$0xff] }
 0x226   :  { %2796 = vmatpush3.bf16.msra.mxu0 %v4170_v40  ;;  %v2622_v40 = vld [vmem:[%s4443_s0 + $0x78] sm:$0xff] }
 0x227   :  { %2797 = vmatprep.subr.bf16.mxu0 %v4176_v41  ;;  %v1366_v41 = vrot.slane %v3606_v31, 3  ;;  %v1694_v31 = vpack.c.bf16 %v2623_v30, %v2621_v11 }
 0x228   :  { %2820 = vmatpush3.bf16.msra.mxu1 %v4182_v32  ;;  %v1695_v32 = vpack.c.bf16 %v2624_v29, %v2622_v40 }
 0x229   :  { %2849 = vmatprep.subr.bf16.mxu1 %v3420_v45  ;;  %v2626_v45 = vld [vmem:[%s4443_s0 + $0x98] sm:$0xff] }
 0x22a   :  { %2798 = vmatpush3.bf16.msra.mxu0 %v4195_v1  ;;  %v1697_v28 = vpack.c.bf16 %v2626_v45, %v2626_v45 }
 0x22b   :  { %1673 = vmatmul.mubr.bf16.vlgmr.msra.gmra.mrb[20].mxu1 %v1540_v39  ;;  %1704 = vmatprep.subr.bf16.mxu0 %v1693_v27  ;;  %v1696_v27 = vpack.c.bf16 %v2625_v37, %v2625_v37 }
 0x22c   :  { %2850 = vmatpush3.bf16.msra.mxu1 %v3430_v47 }
 0x22d   :  { %1499 = vmatmul.mubr.bf16.vlgmr.msra.gmra.mrb[16].mxu0 %v1366_v41  ;;  %2851 = vmatprep.subr.bf16.mxu1 %v3436_v48  ;;  %v1699_v29 = vsel %vm238_vm2, %v1696_v27, 0 }
 0x22e   :  { %1705 = vmatpush1.bf16.msra.mxu0 %v1692_v35  ;;  %1736 = vmatprep.mubr.bf16.mxu0 %v4619_v26 }
 0x22f   :  { %1706 = vmatprep.subr.bf16.mxu0 %v1695_v32 }
 0x230   :  { %2852 = vmatpush3.bf16.msra.mxu1 %v3444_v49 }
 0x231   :  { %2853 = vmatprep.subr.bf16.mxu1 %v3450_v50 }
 0x232   :  { %1707 = vmatpush1.bf16.msra.mxu0 %v1694_v31 }
 0x233   :  { %2627 = vmatprep.subr.msk.bf16.mxu0 %vm238_vm2, %v1697_v28 }
 0x234   :  { %2854 = vmatpush3.bf16.msra.mxu1 %v3456_v51 }
 0x235   :  { %2855 = vmatprep.subr.bf16.mxu1 %v3462_v52 }
 0x236   :  { %1709 = vmatpush1.bf16.msra.mxu0 %v1699_v29 }
 0x237   :  { %2827 = vmatprep.subr.bf16.mxu0 %v3354_v16 }
 0x238   :  { %2856 = vmatpush3.bf16.msra.mxu1 %v3469_v53 }
 0x239   :  { %2628 = vmatmul.mubr.msk.bf16.vlgmr.msra.gmra.mrb[20].mxu0 %vm234_vm3, %v3425_v46  ;;  %2857 = vmatprep.subr.bf16.mxu1 %v3486_v56 }
 0x23a   :  { %2828 = vmatpush3.bf16.msra.mxu0 %v3359_v17 }
 0x23b   :  { %2829 = vmatprep.subr.bf16.mxu0 %v3366_v18 }
 0x23c   :  { %2858 = vmatpush3.bf16.msra.mxu1 %v3492_v57 }
 0x23d   :  { %2859 = vmatprep.subr.bf16.mxu1 %v3508_v60 }
 0x23e   :  { %2830 = vmatpush3.bf16.msra.mxu0 %v3371_v19 }
 0x23f   :  { %2831 = vmatprep.subr.bf16.mxu0 %v3378_v20 }
 0x240   :  { %2860 = vmatpush3.bf16.msra.mxu1 %v3520_v62 }
 0x241   :  { %2861 = vmatprep.subr.bf16.mxu1 %v3534_v0 }
 0x242   :  { %2832 = vmatpush3.bf16.msra.mxu0 %v3383_v21 }
 0x243   :  { %2833 = vmatprep.subr.bf16.mxu0 %v3474_v54 }
 0x244   :  { %2862 = vmatpush3.bf16.msra.mxu1 %v3540_v2 }
 0x245   :  { %2863 = vmatprep.subr.bf16.mxu1 %v3558_v5 }
 0x246   :  { %2834 = vmatpush3.bf16.msra.mxu0 %v3480_v55 }
 0x247   :  { %2835 = vmatprep.subr.bf16.mxu0 %v3497_v58 }
 0x248   :  { %2864 = vmatpush3.bf16.msra.mxu1 %v3564_v6 }
 0x249   :  { %2893 = vmatprep.subr.bf16.mxu1 %v3582_v9 }
 0x24a   :  { %2836 = vmatpush3.bf16.msra.mxu0 %v3502_v59 }
 0x24b   :  { %2837 = vmatprep.subr.bf16.mxu0 %v3513_v61 }
 0x24e   :  { %2838 = vmatpush3.bf16.msra.mxu0 %v3527_v63 }
 0x24f   :  { %2839 = vmatprep.subr.bf16.mxu0 %v3546_v3 }
 0x252   :  { %2840 = vmatpush3.bf16.msra.mxu0 %v3552_v4 }
 0x253   :  { %2841 = vmatprep.subr.bf16.mxu0 %v3570_v7 }
 0x256   :  { %2842 = vmatpush3.bf16.msra.mxu0 %v3576_v8 }
 0x257   :  { %2871 = vmatprep.subr.bf16.mxu0 %v3589_v10 }
 0x29e   :  { %v2689_v16 = vpop.f32.mrb[8].mxu1 }
 0x29f   :  { %v2690_v17 = vpop.f32.mrb[9].mxu1 }
 0x2a0   :  { %v2691_v18 = vadd.f32 %v2690_v17, %v2689_v16  ;;  %v2667_v19 = vpop.f32.mrb[4].mxu0  ;;  %v2692_v20 = vpop.f32.mrb[10].mxu1 }
 0x2a1   :  { %v2668_v21 = vpop.f32.mrb[5].mxu0  ;;  %v2693_v46 = vpop.f32.mrb[11].mxu1 }
 0x2a2   :  { %v2669_v47 = vadd.f32 %v2668_v21, %v2667_v19  ;;  %v2670_v48 = vpop.f32.mrb[6].mxu0 }
 0x2a3   :  { %v2671_v49 = vpop.f32.mrb[7].mxu0 }
 0x2a4   :  { %v630_v50 = vadd.f32 %v2691_v18, %v2669_v47 }
 0x2be   :  { %v2733_v51 = vpop.f32.mrb[12].mxu1 }
 0x2bf   :  { %v2734_v52 = vpop.f32.mrb[13].mxu1 }
 0x2c0   :  { %v2735_v53 = vadd.f32 %v2734_v52, %v2733_v51  ;;  %v2711_v54 = vpop.f32.mrb[8].mxu0  ;;  %v2736_v55 = vpop.f32.mrb[14].mxu1  ;;  %v4633_v51 = vld [vmem:[#allocation19_spill] sm:$0xff]  ;;  %v4634_v52 = vld [vmem:[#allocation20_spill] sm:$0xff] }
 0x2c1   :  { %v2712_v56 = vpop.f32.mrb[9].mxu0  ;;  %v2737_v57 = vpop.f32.mrb[15].mxu1  ;;  %v4636_v55 = vld [vmem:[#allocation22_spill] sm:$0xff] }
 0x2c2   :  { %v2713_v58 = vadd.f32 %v2712_v56, %v2711_v54  ;;  %v2714_v59 = vpop.f32.mrb[10].mxu0  ;;  %v4637_v56 = vld [vmem:[#allocation23_spill] sm:$0xff] }
 0x2c3   :  { %v2715_v60 = vpop.f32.mrb[11].mxu0  ;;  %v4638_v59 = vld [vmem:[#allocation24_spill] sm:$0xff] }
 0x2c4   :  { %v810_v61 = vadd.f32 %v2713_v58, %v630_v50  ;;  %v4639_v60 = vld [vmem:[#allocation25_spill] sm:$0xff] }
 0x2c6   :  { %v984_v62 = vadd.f32 %v2735_v53, %v810_v61  ;;  %v4635_v53 = vld [vmem:[#allocation21_spill] sm:$0xff] }
 0x2de   :  { %v2777_v63 = vpop.f32.mrb[16].mxu1 }
 0x2df   :  { %v2778_v0 = vpop.f32.mrb[17].mxu1 }
 0x2e0   :  { %v2779_v2 = vadd.f32 %v2778_v0, %v2777_v63  ;;  %v2755_v3 = vpop.f32.mrb[12].mxu0  ;;  %v2780_v4 = vpop.f32.mrb[18].mxu1  ;;  %v4641_v63 = vld [vmem:[#allocation27_spill] sm:$0xff]  ;;  %v4642_v0 = vld [vmem:[#allocation28_spill] sm:$0xff] }
 0x2e1   :  { %v2756_v5 = vpop.f32.mrb[13].mxu0  ;;  %v2781_v6 = vpop.f32.mrb[19].mxu1  ;;  %v4645_v4 = vld [vmem:[#allocation31_spill] sm:$0xff] }
 0x2e2   :  { %v2757_v7 = vadd.f32 %v2756_v5, %v2755_v3  ;;  %v2758_v8 = vpop.f32.mrb[14].mxu0  ;;  %v4644_v3 = vld [vmem:[#allocation30_spill] sm:$0xff]  ;;  %v4646_v5 = vld [vmem:[#allocation32_spill] sm:$0xff]  ;;  %v4647_v6 = vld [vmem:[#allocation33_spill] sm:$0xff] }
 0x2e3   :  { %v2759_v9 = vpop.f32.mrb[15].mxu0  ;;  %v4649_v8 = vld [vmem:[#allocation35_spill] sm:$0xff] }
 0x2e4   :  { %v1158_v10 = vadd.f32 %v2757_v7, %v984_v62  ;;  %v4640_v62 = vld [vmem:[#allocation26_spill] sm:$0xff]  ;;  %v4650_v9 = vld [vmem:[#allocation36_spill] sm:$0xff] }
 0x2e5   :  { %v4648_v7 = vld [vmem:[#allocation34_spill] sm:$0xff] }
 0x2e6   :  { %v1332_v11 = vadd.f32 %v2779_v2, %v1158_v10  ;;  %v4643_v2 = vld [vmem:[#allocation29_spill] sm:$0xff] }
 0x2e7   :  { %v4651_v10 = vld [vmem:[#allocation37_spill] sm:$0xff] }
 0x2fe   :  { %v2821_v30 = vpop.f32.mrb[20].mxu1 }
 0x2ff   :  { %v2822_v40 = vpop.f32.mrb[21].mxu1 }
 0x300   :  { %v2823_v41 = vadd.f32 %v2822_v40, %v2821_v30  ;;  %v2799_v32 = vpop.f32.mrb[16].mxu0  ;;  %v2824_v39 = vpop.f32.mrb[22].mxu1  ;;  %v4653_v30 = vld [vmem:[#allocation39_spill] sm:$0xff]  ;;  %v4654_v40 = vld [vmem:[#allocation40_spill] sm:$0xff] }
 0x301   :  { %v2800_v35 = vpop.f32.mrb[17].mxu0  ;;  %v2825_v45 = vpop.f32.mrb[23].mxu1  ;;  %v4657_v39 = vld [vmem:[#allocation43_spill] sm:$0xff] }
 0x302   :  { %v2801_v37 = vadd.f32 %v2800_v35, %v2799_v32  ;;  %v2802_v31 = vpop.f32.mrb[18].mxu0  ;;  %v4656_v32 = vld [vmem:[#allocation42_spill] sm:$0xff]  ;;  %v4658_v35 = vld [vmem:[#allocation44_spill] sm:$0xff]  ;;  %v4659_v45 = vld [vmem:[#allocation45_spill] sm:$0xff] }
 0x303   :  { %v2803_v26 = vpop.f32.mrb[19].mxu0  ;;  %v4661_v31 = vld [vmem:[#allocation47_spill] sm:$0xff] }
 0x304   :  { %v1506_v28 = vadd.f32 %v2801_v37, %v1332_v11  ;;  %v4652_v11 = vld [vmem:[#allocation38_spill] sm:$0xff]  ;;  %v4662_v26 = vld [vmem:[#allocation48_spill] sm:$0xff] }
 0x305   :  { %v4660_v37 = vld [vmem:[#allocation46_spill] sm:$0xff] }
 0x306   :  { %v4265_v27 = vadd.f32 %v2823_v41, %v1506_v28  ;;  %v4655_v41 = vld [vmem:[#allocation41_spill] sm:$0xff] }
 0x307   :  { %v4663_v28 = vld [vmem:[#allocation49_spill] sm:$0xff] }
 0x30c   :  { %v1738_v29 = vpop.f32.mrb[20].mxu0 }
 0x30d   :  { %v1739_v16 = vadd.f32 %v1738_v29, %v3597_v15  ;;  %v1740_v17 = vpop.f32.mrb[21].mxu0  ;;  %v4664_v29 = vld [vmem:[#allocation50_spill] sm:$0xff] }
 0x30e   :  { %v1741_v18 = vadd.f32 %v1740_v17, %v3602_v22  ;;  %v1742_v19 = vpop.f32.mrb[22].mxu0  ;;  %v4666_v17 = vld [vmem:[#allocation52_spill] sm:$0xff] }
 0x30f   :  { %v1745_v20 = vmax.f32 %v1739_v16, 0.0  ;;  %v1743_v21 = vpop.f32.mrb[23].mxu0  ;;  %v4665_v16 = vld [vmem:[#allocation51_spill] sm:$0xff] }
 0x310   :  { %v1746_v46 = vmax.f32 %v1741_v18, 0.0  ;;  %v4667_v18 = vld [vmem:[#allocation53_spill] sm:$0xff]  ;;  %v4669_v21 = vld [vmem:[#allocation55_spill] sm:$0xff] }
 0x311   :  { %v4269_v47 = vpack.c.bf16 %v1745_v20, %v1745_v20  ;;  %v4668_v20 = vld [vmem:[#allocation54_spill] sm:$0xff] }
 0x312   :  { %v4271_v48 = vpack.c.bf16 %v1746_v46, %v1746_v46 }
 0x313   :  { %v4279_v15 = vshrl.u32 %v4269_v47, 16  ;;  %v1839_v58 = vrot.slane %v4269_v47, 1 }
 0x314   :  { %1829 = vmatprep.mubr.bf16.mxu1 %v4271_v48  ;;  %v4275_v49 = vshrl.u32 %v4271_v48, 16  ;;  %v1840_v22 = vrot.slane %v4271_v48, 1  ;;  %v1930_v61 = vrot.slane %v4271_v48, 2 }
 0x315   :  { %1830 = vmatmul.mubr.bf16.vlgmr.msra.gmra.mrb[24].mxu1 %v4269_v47  ;;  %v1884_v54 = vrot.slane %v4279_v15, 1  ;;  %v1974_v19 = vrot.slane %v4279_v15, 2 }
 0x316   :  { %2894 = vmatpush3.bf16.msra.mxu1 %v3613_v33  ;;  %1789 = vmatprep.mubr.bf16.mxu0 %v4275_v49  ;;  %v1885_v50 = vrot.slane %v4275_v49, 1  ;;  %v4620_v33 = vld [vmem:[#allocation6_spill] sm:$0xff]  ;;  %v1975_v57 = vrot.slane %v4275_v49, 2  ;;  %v2065_v46 = vrot.slane %v4275_v49, 3 }
 0x317   :  { %1790 = vmatmul.mubr.bf16.vlgmr.msra.gmra.mrb[24].mxu0 %v4279_v15  ;;  %2895 = vmatprep.subr.bf16.mxu1 %v3618_v34  ;;  %v4621_v34 = vld [vmem:[#allocation7_spill] sm:$0xff]  ;;  %v4676_v49 = vld [vmem:[#allocation62_spill] sm:$0xff] }
 0x318   :  { %2872 = vmatpush3.bf16.msra.mxu0 %v3627_v36  ;;  %1875 = vmatprep.mubr.bf16.mxu0 %v1840_v22  ;;  %v4622_v36 = vld [vmem:[#allocation8_spill] sm:$0xff]  ;;  %v1929_v22 = vrot.slane %v4269_v47, 2 }
 0x319   :  { %1920 = vmatprep.mubr.bf16.mxu1 %v1885_v50  ;;  %2873 = vmatprep.subr.bf16.mxu0 %v3636_v38  ;;  %v4623_v38 = vld [vmem:[#allocation9_spill] sm:$0xff]  ;;  %v4670_v50 = vld [vmem:[#allocation56_spill] sm:$0xff] }
 0x31a   :  { %2896 = vmatpush3.bf16.msra.mxu1 %v3645_v42  ;;  %v4624_v42 = vld [vmem:[#allocation10_spill] sm:$0xff] }
 0x31b   :  { %2897 = vmatprep.subr.bf16.mxu1 %v3652_v43  ;;  %v4625_v43 = vld [vmem:[#allocation11_spill] sm:$0xff] }
 0x31c   :  { %2874 = vmatpush3.bf16.msra.mxu0 %v3658_v44  ;;  %v4626_v44 = vld [vmem:[#allocation12_spill] sm:$0xff] }
 0x31d   :  { %2875 = vmatprep.subr.bf16.mxu0 %v3664_v12  ;;  %v4627_v12 = vld [vmem:[#allocation13_spill] sm:$0xff] }
 0x31e   :  { %2898 = vmatpush3.bf16.msra.mxu1 %v3670_v13  ;;  %v4628_v13 = vld [vmem:[#allocation14_spill] sm:$0xff] }
 0x31f   :  { %2899 = vmatprep.subr.bf16.mxu1 %v3676_v14  ;;  %v4629_v14 = vld [vmem:[#allocation15_spill] sm:$0xff] }
 0x320   :  { %2876 = vmatpush3.bf16.msra.mxu0 %v3682_v23  ;;  %v4630_v23 = vld [vmem:[#allocation16_spill] sm:$0xff] }
 0x321   :  { %2877 = vmatprep.subr.bf16.mxu0 %v3688_v24  ;;  %v4631_v24 = vld [vmem:[#allocation17_spill] sm:$0xff] }
 0x322   :  { %2900 = vmatpush3.bf16.msra.mxu1 %v3694_v25  ;;  %v4632_v25 = vld [vmem:[#allocation18_spill] sm:$0xff] }
 0x323   :  { %2901 = vmatprep.subr.bf16.mxu1 %v4620_v33  ;;  %v4671_v33 = vld [vmem:[#allocation57_spill] sm:$0xff] }
 0x324   :  { %2878 = vmatpush3.bf16.msra.mxu0 %v4621_v34  ;;  %v2020_v34 = vrot.slane %v4271_v48, 3  ;;  %v4681_v48 = vld [vmem:[#allocation67_spill] sm:$0xff] }
 0x325   :  { %2879 = vmatprep.subr.bf16.mxu0 %v4622_v36  ;;  %v4672_v36 = vld [vmem:[#allocation58_spill] sm:$0xff] }
 0x326   :  { %2902 = vmatpush3.bf16.msra.mxu1 %v4623_v38  ;;  %v4673_v38 = vld [vmem:[#allocation59_spill] sm:$0xff] }
 0x327   :  { %2903 = vmatprep.subr.bf16.mxu1 %v4624_v42  ;;  %v4674_v42 = vld [vmem:[#allocation60_spill] sm:$0xff] }
 0x328   :  { %2880 = vmatpush3.bf16.msra.mxu0 %v4625_v43  ;;  %v4675_v43 = vld [vmem:[#allocation61_spill] sm:$0xff] }
 0x329   :  { %2881 = vmatprep.subr.bf16.mxu0 %v4626_v44  ;;  %v4677_v44 = vld [vmem:[#allocation63_spill] sm:$0xff] }
 0x32a   :  { %2904 = vmatpush3.bf16.msra.mxu1 %v4627_v12  ;;  %v4678_v12 = vld [vmem:[#allocation64_spill] sm:$0xff] }
 0x32b   :  { %2905 = vmatprep.subr.bf16.mxu1 %v4628_v13  ;;  %v4679_v13 = vld [vmem:[#allocation65_spill] sm:$0xff] }
 0x32c   :  { %2882 = vmatpush3.bf16.msra.mxu0 %v4629_v14  ;;  %v4680_v14 = vld [vmem:[#allocation66_spill] sm:$0xff] }
 0x32d   :  { %2883 = vmatprep.subr.bf16.mxu0 %v4630_v23  ;;  %v4682_v23 = vld [vmem:[#allocation68_spill] sm:$0xff] }
 0x32e   :  { %2906 = vmatpush3.bf16.msra.mxu1 %v4631_v24  ;;  %v4683_v24 = vld [vmem:[#allocation69_spill] sm:$0xff] }
 0x32f   :  { %2907 = vmatprep.subr.bf16.mxu1 %v4632_v25  ;;  %v4684_v25 = vld [vmem:[#allocation70_spill] sm:$0xff] }
 0x330   :  { %2884 = vmatpush3.bf16.msra.mxu0 %v4633_v51  ;;  %v4685_v51 = vld [vmem:[#allocation71_spill] sm:$0xff] }
 0x331   :  { %2885 = vmatprep.subr.bf16.mxu0 %v4634_v52  ;;  %v4686_v52 = vld [vmem:[#allocation72_spill] sm:$0xff] }
 0x332   :  { %2908 = vmatpush3.bf16.msra.mxu1 %v4635_v53  ;;  %v4687_v53 = vld [vmem:[#allocation73_spill] sm:$0xff] }
 0x333   :  { %2937 = vmatprep.subr.bf16.mxu1 %v4636_v55  ;;  %v4689_v55 = vld [vmem:[#allocation75_spill] sm:$0xff] }
 0x334   :  { %2886 = vmatpush3.bf16.msra.mxu0 %v4637_v56  ;;  %v4690_v56 = vld [vmem:[#allocation76_spill] sm:$0xff] }
 0x335   :  { %1921 = vmatmul.mubr.bf16.vlgmr.msra.gmra.mrb[28].mxu1 %v1884_v54  ;;  %2915 = vmatprep.subr.bf16.mxu0 %v4638_v59  ;;  %v4688_v54 = vld [vmem:[#allocation74_spill] sm:$0xff]  ;;  %v4693_v59 = vld [vmem:[#allocation79_spill] sm:$0xff] }
 0x336   :  { %2938 = vmatpush3.bf16.msra.mxu1 %v4639_v60  ;;  %2010 = vmatprep.mubr.bf16.mxu1 %v1975_v57  ;;  %v4691_v57 = vld [vmem:[#allocation77_spill] sm:$0xff]  ;;  %v4694_v60 = vld [vmem:[#allocation80_spill] sm:$0xff] }
 0x337   :  { %1876 = vmatmul.mubr.bf16.vlgmr.msra.gmra.mrb[28].mxu0 %v1839_v58  ;;  %2939 = vmatprep.subr.bf16.mxu1 %v4640_v62  ;;  %v4692_v58 = vld [vmem:[#allocation78_spill] sm:$0xff] }
 0x338   :  { %2916 = vmatpush3.bf16.msra.mxu0 %v4641_v63  ;;  %1965 = vmatprep.mubr.bf16.mxu0 %v1930_v61  ;;  %v4695_v61 = vld [vmem:[#allocation81_spill] sm:$0xff]  ;;  %v4696_v62 = vld [vmem:[#allocation82_spill] sm:$0xff]  ;;  %v4697_v63 = vld [vmem:[#allocation83_spill] sm:$0xff] }
 0x339   :  { %2917 = vmatprep.subr.bf16.mxu0 %v4642_v0  ;;  %v4698_v0 = vld [vmem:[#allocation84_spill] sm:$0xff] }
 0x33a   :  { %2940 = vmatpush3.bf16.msra.mxu1 %v4643_v2  ;;  %v4699_v2 = vld [vmem:[#allocation85_spill] sm:$0xff] }
 0x33b   :  { %2941 = vmatprep.subr.bf16.mxu1 %v4644_v3  ;;  %v2064_v3 = vrot.slane %v4279_v15, 3  ;;  %v3203_v15 = vld [vmem:[%s4452_s9 + $0x8] sm:$0xff]  }
 0x33c   :  { %2918 = vmatpush3.bf16.msra.mxu0 %v4645_v4  ;;  %v2019_v4 = vrot.slane %v4269_v47, 3  ;;  %v3205_v47 = vld [vmem:[%s4452_s9 + $0x18] sm:$0xff]  }
 0x33d   :  { %2919 = vmatprep.subr.bf16.mxu0 %v4646_v5  ;;  %v4700_v5 = vmov 0.0  }
 0x33e   :  { %2942 = vmatpush3.bf16.msra.mxu1 %v4647_v6  ;;  %v3202_v6 = vld [vmem:[%s4452_s9] sm:$0xff]  }
 0x33f   :  { %2943 = vmatprep.subr.bf16.mxu1 %v4648_v7  ;;  %v3206_v7 = vld [vmem:[%s4452_s9 + $0x20] sm:$0xff]  }
 0x340   :  { %2920 = vmatpush3.bf16.msra.mxu0 %v4649_v8  ;;  %v3207_v8 = vld [vmem:[%s4452_s9 + $0x28] sm:$0xff]  }
 0x341   :  { %2921 = vmatprep.subr.bf16.mxu0 %v4650_v9  ;;  %v3208_v9 = vld [vmem:[%s4452_s9 + $0x30] sm:$0xff]  }
 0x342   :  { %2944 = vmatpush3.bf16.msra.mxu1 %v4651_v10  ;;  %v3209_v10 = vld [vmem:[%s4452_s9 + $0x38] sm:$0xff]  }
 0x343   :  { %2945 = vmatprep.subr.bf16.mxu1 %v4652_v11 }
 0x344   :  { %2922 = vmatpush3.bf16.msra.mxu0 %v4653_v30 }
 0x345   :  { %2923 = vmatprep.subr.bf16.mxu0 %v4654_v40 }
 0x346   :  { %2946 = vmatpush3.bf16.msra.mxu1 %v4655_v41 }
 0x347   :  { %2947 = vmatprep.subr.bf16.mxu1 %v4656_v32 }
 0x348   :  { %2924 = vmatpush3.bf16.msra.mxu0 %v4657_v39 }
 0x349   :  { %2925 = vmatprep.subr.bf16.mxu0 %v4658_v35 }
 0x34a   :  { %2948 = vmatpush3.bf16.msra.mxu1 %v4659_v45 }
 0x34b   :  { %2949 = vmatprep.subr.bf16.mxu1 %v4660_v37 }
 0x34c   :  { %2926 = vmatpush3.bf16.msra.mxu0 %v4661_v31 }
 0x34d   :  { %2927 = vmatprep.subr.bf16.mxu0 %v4662_v26 }
 0x34e   :  { %2950 = vmatpush3.bf16.msra.mxu1 %v4663_v28 }
 0x34f   :  { %2951 = vmatprep.subr.bf16.mxu1 %v4664_v29 }
 0x350   :  { %2928 = vmatpush3.bf16.msra.mxu0 %v4665_v16 }
 0x351   :  { %2929 = vmatprep.subr.bf16.mxu0 %v4666_v17 }
 0x352   :  { %2952 = vmatpush3.bf16.msra.mxu1 %v4667_v18 }
 0x353   :  { %2981 = vmatprep.subr.bf16.mxu1 %v4668_v20 }
 0x354   :  { %2930 = vmatpush3.bf16.msra.mxu0 %v4669_v21 }
 0x355   :  { %2011 = vmatmul.mubr.bf16.vlgmr.msra.gmra.mrb[32].mxu1 %v1974_v19  ;;  %2959 = vmatprep.subr.bf16.mxu0 %v4670_v50 }
 0x356   :  { %2982 = vmatpush3.bf16.msra.mxu1 %v4671_v33  ;;  %2100 = vmatprep.mubr.bf16.mxu1 %v2065_v46 }
 0x357   :  { %1966 = vmatmul.mubr.bf16.vlgmr.msra.gmra.mrb[32].mxu0 %v1929_v22  ;;  %2983 = vmatprep.subr.bf16.mxu1 %v4672_v36 }
 0x358   :  { %2960 = vmatpush3.bf16.msra.mxu0 %v4673_v38  ;;  %2055 = vmatprep.mubr.bf16.mxu0 %v2020_v34 }
 0x359   :  { %2961 = vmatprep.subr.bf16.mxu0 %v4674_v42 }
 0x35a   :  { %2984 = vmatpush3.bf16.msra.mxu1 %v4675_v43 }
 0x35b   :  { %2985 = vmatprep.subr.bf16.mxu1 %v4676_v49 }
 0x35c   :  { %2962 = vmatpush3.bf16.msra.mxu0 %v4677_v44 }
 0x35d   :  { %2963 = vmatprep.subr.bf16.mxu0 %v4678_v12 }
 0x35e   :  { %2986 = vmatpush3.bf16.msra.mxu1 %v4679_v13 }
 0x35f   :  { %2987 = vmatprep.subr.bf16.mxu1 %v4680_v14 }
 0x360   :  { %2964 = vmatpush3.bf16.msra.mxu0 %v4681_v48 }
 0x361   :  { %2965 = vmatprep.subr.bf16.mxu0 %v4682_v23 }
 0x362   :  { %2988 = vmatpush3.bf16.msra.mxu1 %v4683_v24 }
 0x363   :  { %2989 = vmatprep.subr.bf16.mxu1 %v4684_v25 }
 0x364   :  { %2966 = vmatpush3.bf16.msra.mxu0 %v4685_v51 }
 0x365   :  { %2967 = vmatprep.subr.bf16.mxu0 %v4686_v52 }
 0x366   :  { %2990 = vmatpush3.bf16.msra.mxu1 %v4687_v53 }
 0x367   :  { %2991 = vmatprep.subr.bf16.mxu1 %v4688_v54 }
 0x368   :  { %2968 = vmatpush3.bf16.msra.mxu0 %v4689_v55 }
 0x369   :  { %2969 = vmatprep.subr.bf16.mxu0 %v4690_v56 }
 0x36a   :  { %2992 = vmatpush3.bf16.msra.mxu1 %v4691_v57 }
 0x36b   :  { %2993 = vmatprep.subr.bf16.mxu1 %v4692_v58 }
 0x36c   :  { %2970 = vmatpush3.bf16.msra.mxu0 %v4693_v59 }
 0x36d   :  { %2971 = vmatprep.subr.bf16.mxu0 %v4694_v60 }
 0x36e   :  { %2994 = vmatpush3.bf16.msra.mxu1 %v4695_v61 }
 0x36f   :  { %2995 = vmatprep.subr.bf16.mxu1 %v4696_v62 }
 0x370   :  { %2972 = vmatpush3.bf16.msra.mxu0 %v4697_v63  ;;  %v2629_v63 = vld [vmem:[%s4451_s8] ss:$0 sm:$0xff]  ;;  %s3210_s8 = scalar_lea.vmem %s2244_s20, 32 }
 0x371   :  { %2973 = vmatprep.subr.bf16.mxu0 %v4698_v0  ;;  %v4701_v0 = vld [vmem:[#allocation5_spill] sm:$0xff]  ;;  %p3211_p0 = scmp.ne.s32.totalorder %s2244_s20, %s3210_s8  ;;  %p3216_p2 = scmp.lt.s32.totalorder %s3210_s8, %s3210_s8 }
 0x372   :  { %2996 = vmatpush3.bf16.msra.mxu1 %v4699_v2 }
 0x373   :  { %p3217_p3 = por %p3216_p2, %p3215_p1 }
 0x374   :  { %2974 = vmatpush3.bf16.msra.mxu0 %v4195_v1  ;;  %v3204_v1 = vld [vmem:[%s4452_s9 + $0x10] sm:$0xff]  }
 0x375   :  { %2101 = vmatmul.mubr.bf16.vlgmr.msra.gmra.mrb[36].mxu1 %v2064_v3  ;;  %3040 = vmatprep.subr.bf16.mxu0 %v4700_v5  ;;  %p3218_p4 = pnand %p3217_p3, %p3211_p0 }
 0x377   :  { %2056 = vmatmul.mubr.bf16.vlgmr.msra.gmra.mrb[36].mxu0 %v2019_v4 }
 0x378   :  { %3056 = vmatprep.mubr.msk.bf16.mxu0 %vm3235_vm0, %v4700_v5  ;;  %3041 = vmatpush3.bf16.msra.mxu0 %v3202_v6  ;;  %v2630_v6 = vld [vmem:[%s4453_s10] ss:$0 sm:$0xff] }
 0x379   :  { %3042 = vmatprep.subr.bf16.mxu0 %v4700_v5 }
 0x37c   :  { %3043 = vmatpush3.bf16.msra.mxu0 %v3203_v15 }
 0x37d   :  { %3044 = vmatprep.subr.bf16.mxu0 %v4700_v5 }
 0x380   :  { %3045 = vmatpush3.bf16.msra.mxu0 %v3204_v1 }
 0x381   :  { %3046 = vmatprep.subr.bf16.mxu0 %v4700_v5 }
 0x384   :  { %3047 = vmatpush3.bf16.msra.mxu0 %v3205_v47 }
 0x385   :  { %3048 = vmatprep.subr.bf16.mxu0 %v4700_v5 }
 0x388   :  { %3049 = vmatpush3.bf16.msra.mxu0 %v3206_v7 }
 0x389   :  { %3050 = vmatprep.subr.bf16.mxu0 %v4700_v5 }
 0x38c   :  { %3051 = vmatpush3.bf16.msra.mxu0 %v3207_v8 }
 0x38d   :  { %3052 = vmatprep.subr.bf16.mxu0 %v4700_v5 }
 0x390   :  { %3053 = vmatpush3.bf16.msra.mxu0 %v3208_v9 }
 0x391   :  { %3054 = vmatprep.subr.bf16.mxu0 %v4700_v5 }
 0x394   :  { %3055 = vmatpush3.bf16.msra.mxu0 %v3209_v10 }
 0x3e8   :  { %v2865_v11 = vpop.f32.mrb[24].mxu1 }
 0x3e9   :  { %v2866_v30 = vpop.f32.mrb[25].mxu1 }
 0x3ea   :  { %v2867_v40 = vadd.f32 %v2866_v30, %v2865_v11  ;;  %v2843_v41 = vpop.f32.mrb[24].mxu0  ;;  %v2868_v32 = vpop.f32.mrb[26].mxu1 }
 0x3eb   :  { %v2844_v39 = vpop.f32.mrb[25].mxu0  ;;  %v2869_v35 = vpop.f32.mrb[27].mxu1 }
 0x3ec   :  { %v2845_v45 = vadd.f32 %v2844_v39, %v2843_v41  ;;  %v2846_v37 = vpop.f32.mrb[26].mxu0 }
 0x3ed   :  { %v2847_v31 = vpop.f32.mrb[27].mxu0 }
 0x3ee   :  { %v1832_v26 = vadd.f32 %v2867_v40, %v2845_v45 }
 0x408   :  { %v2909_v28 = vpop.f32.mrb[28].mxu1 }
 0x409   :  { %v2910_v29 = vpop.f32.mrb[29].mxu1 }
 0x40a   :  { %v2911_v16 = vadd.f32 %v2910_v29, %v2909_v28  ;;  %v2887_v17 = vpop.f32.mrb[28].mxu0  ;;  %v2912_v18 = vpop.f32.mrb[30].mxu1 }
 0x40b   :  { %v2888_v19 = vpop.f32.mrb[29].mxu0  ;;  %v2913_v20 = vpop.f32.mrb[31].mxu1 }
 0x40c   :  { %v2889_v21 = vadd.f32 %v2888_v19, %v2887_v17  ;;  %v2890_v46 = vpop.f32.mrb[30].mxu0 }
 0x40d   :  { %v2891_v22 = vpop.f32.mrb[31].mxu0 }
 0x40e   :  { %v1883_v50 = vadd.f32 %v2889_v21, %v1832_v26 }
 0x410   :  { %v1928_v33 = vadd.f32 %v2911_v16, %v1883_v50 }
 0x428   :  { %v2953_v34 = vpop.f32.mrb[32].mxu1 }
 0x429   :  { %v2954_v36 = vpop.f32.mrb[33].mxu1 }
 0x42a   :  { %v2955_v38 = vadd.f32 %v2954_v36, %v2953_v34  ;;  %v2931_v42 = vpop.f32.mrb[32].mxu0  ;;  %v2956_v43 = vpop.f32.mrb[34].mxu1 }
 0x42b   :  { %v2932_v49 = vpop.f32.mrb[33].mxu0  ;;  %v2957_v44 = vpop.f32.mrb[35].mxu1 }
 0x42c   :  { %v2933_v12 = vadd.f32 %v2932_v49, %v2931_v42  ;;  %v2934_v13 = vpop.f32.mrb[34].mxu0 }
 0x42d   :  { %v2935_v14 = vpop.f32.mrb[35].mxu0 }
 0x42e   :  { %v1973_v48 = vadd.f32 %v2933_v12, %v1928_v33 }
 0x430   :  { %v2018_v23 = vadd.f32 %v2955_v38, %v1973_v48 }
 0x448   :  { %v2997_v24 = vpop.f32.mrb[36].mxu1 }
 0x449   :  { %v2998_v25 = vpop.f32.mrb[37].mxu1 }
 0x44a   :  { %v2999_v51 = vadd.f32 %v2998_v25, %v2997_v24  ;;  %v2975_v52 = vpop.f32.mrb[36].mxu0  ;;  %v3000_v53 = vpop.f32.mrb[38].mxu1 }
 0x44b   :  { %v2976_v54 = vpop.f32.mrb[37].mxu0  ;;  %v3001_v55 = vpop.f32.mrb[39].mxu1 }
 0x44c   :  { %v2977_v56 = vadd.f32 %v2976_v54, %v2975_v52  ;;  %v2978_v57 = vpop.f32.mrb[38].mxu0 }
 0x44d   :  { %v2979_v58 = vpop.f32.mrb[39].mxu0 }
 0x44e   :  { %v2063_v59 = vadd.f32 %v2977_v56, %v2018_v23 }
 0x450   :  { %v2108_v60 = vadd.f32 %v2999_v51, %v2063_v59 }
 0x452   :  { %v2110_v61 = vrot.slane %v2108_v60, 7 }
 0x454   :  { %v2113_v62 = vsel %vm2112_vm4, %v4265_v27, %v2110_v61 }
 0x455   :  { %v2114_v2 = vadd.f32 %v2113_v62, %v4701_v0 }
 0x457   :  { %v2122_v3 = vadd.f32 %v2629_v63, %v2114_v2 }
 0x459   :  { %v2123_v4 = vmax.f32 %v2122_v3, 0.0 }
 0x45b   :  { %v2124_v5 = vpack.c.bf16 %v2123_v4, %v2123_v4 }
 0x45d   :  { %3057 = vmatmul.mubr.bf16.vlgmr.msra.gmra.mrb[40].mxu0 %v2124_v5 }
 0x530   :  { %v2230_v15 = vpop.f32.mrb[40].mxu0 }
 0x531   :  { %v2231_v1 = vadd.f32 %v2630_v6, %v2230_v15  ;;  %v3058_v47 = vpop.f32.mrb[41].mxu0 }
 0x532   :  { %v2233_v27 = vpop.f32.mrb[42].mxu0 }
 0x533   :  { %2236 = vst [vmem:[#allocation2] sm:$0x3] %v2231_v1  ;;  %v3059_v7 = vpop.f32.mrb[43].mxu0 }
 0x534   :  { %3221 = shalt.err (!%p3218_p4)
}
 0x535   :  { %s3222_s10 = scalar_lea.hbm %s4454_s11, 32 }
 0x536   :  { %p3223_p5 = scmp.ne.s32.totalorder %s4454_s11, %s3222_s10  ;;  %p3226_p6 = scmp.lt.u32.totalorder %s3222_s10, %s4454_s11 }
 0x538   :  { %p3228_p7 = pnand %p3226_p6, %p3223_p5 }
 0x53a   :  { %3231 = shalt.err (!%p3228_p7)
}
 0x53b   :  { %2246 = dma.vmem_to_hbm [thread:$0]  %s2244_s20, 32, %s4454_s11, [#allocation3]  }
 0x53c   :  { %3232 = dma.done.wait [#allocation3], 32  }
 0x53d   :  { %3233 = vsyncadd [#allocation3], 4294967264 }
 0x53e   :  { %2250 = vsyncpa [#allocation3], 1 }

</bundles_post_ra>
